<compile_context>
chip_gen: v6e
topology: v6e:2x2x1
jax: 0.10.0
libtpu: 0.0.40
codegen_flags: <defaults>
</compile_context>

<pallas_src>
import functools

import jax
import jax.numpy as jnp
from jax.experimental import pallas as pl
from jax.experimental.pallas import tpu as pltpu

N_STEPS = 3
LANE = 128


def _round_up(v, m):
    return ((v + m - 1) // m) * m


def _gatedgcn_kernel(x_ref, adj_ref, wp_ref, bp_ref, wl_ref, bl_ref,
                     wi_ref, wh_ref, br_ref, bz_ref, bin_ref, bhn_ref,
                     wo_ref, bo_ref, out_ref, h_scr, m_scr,
                     *, tm, hp, n_steps, n_pad, adj_resident):
    s = pl.program_id(0)            # phase: 0 = projection, 1..n_steps = GRU step
    j = pl.program_id(1)            # dst-node tile
    row0 = pl.multiple_of(j * tm, tm)
    rows = pl.ds(row0, tm)
    bf16 = jnp.bfloat16

    @pl.when(s == 0)
    def _projection():
        # linear_projection + ReLU (eval-mode dropout == identity)
        h = jnp.dot(x_ref[...], wp_ref[...],
                    preferred_element_type=jnp.float32) + bp_ref[...]
        h = jnp.maximum(h, 0.0)
        h_scr[rows, :] = h
        # messages consumed by step 1: m = h @ Wl + bl  -> ping-pong slot 0
        m = jnp.dot(h.astype(bf16), wl_ref[...],
                    preferred_element_type=jnp.float32) + bl_ref[...]
        m_scr[rows, :] = m.astype(bf16)

    @pl.when(s > 0)
    def _gru_step():
        read_base = pl.multiple_of(((s + 1) % 2) * n_pad, tm)
        write_base = pl.multiple_of((s % 2) * n_pad + row0, tm)

        # aggregation: a = A[tile, :] @ m_prev  (sum over in-neighbours; the
        # per-edge bias of DGL's edge Linear is degree-scaled via A's counts)
        m_prev = m_scr[pl.ds(read_base, n_pad), :]            # bf16 MXU RHS
        adj_rows = adj_ref[rows, :] if adj_resident else adj_ref[...]
        a = jnp.dot(adj_rows, m_prev, preferred_element_type=jnp.float32)
        h_old = h_scr[rows, :]

        # fused GRU matmuls: one (tm,H)x(H,3H) per operand, gate order [r|z|n]
        gi = jnp.dot(a.astype(bf16), wi_ref[...],
                     preferred_element_type=jnp.float32)
        gh = jnp.dot(h_old.astype(bf16), wh_ref[...],
                     preferred_element_type=jnp.float32)

        r = jax.nn.sigmoid(gi[:, 0:hp] + gh[:, 0:hp] + br_ref[...])
        z = jax.nn.sigmoid(gi[:, hp:2 * hp] + gh[:, hp:2 * hp] + bz_ref[...])
        n = jnp.tanh(gi[:, 2 * hp:3 * hp] + bin_ref[...]
                     + r * (gh[:, 2 * hp:3 * hp] + bhn_ref[...]))
        h_new = (1.0 - z) * n + z * h_old
        h_scr[rows, :] = h_new

        @pl.when(s < n_steps)
        def _next_messages():
            m = jnp.dot(h_new.astype(bf16), wl_ref[...],
                        preferred_element_type=jnp.float32) + bl_ref[...]
            m_scr[pl.ds(write_base, tm), :] = m.astype(bf16)

        @pl.when(s == n_steps)
        def _output():
            out_ref[...] = (jnp.dot(h_new.astype(bf16), wo_ref[...],
                                    preferred_element_type=jnp.float32)
                            + bo_ref[...])


@functools.partial(jax.jit, static_argnames=("tile_m", "vmem_budget_bytes"))
def gatedgcn_forward(x, adj, params, *, tile_m=256,
                     vmem_budget_bytes=64 * 1024 * 1024):
    assert tile_m % 128 == 0, "tile_m must be a multiple of 128"
    n, in_feats = x.shape
    hidden = params["wp"].shape[1]
    out_dim = params["wo"].shape[1]

    hp = _round_up(hidden, LANE)              # lane-dense hidden
    out_pad = _round_up(out_dim, LANE)        # lane-dense output head
    tm = min(tile_m, _round_up(n, LANE))      # collapse tile axis for small graphs
    n_pad = _round_up(n, tm)
    n_tiles = n_pad // tm

    bf16, f32 = jnp.bfloat16, jnp.float32

    def pad2(a, r, c):
        return jnp.pad(a, ((0, r - a.shape[0]), (0, c - a.shape[1])))

    # pad + cast once in the wrapper (padded rows/cols are all-zero)
    x_p = jnp.pad(x, ((0, n_pad - n), (0, 0))).astype(bf16)
    adj_p = jnp.pad(adj, ((0, n_pad - n), (0, n_pad - n))).astype(bf16)

    wp = pad2(params["wp"], in_feats, hp).astype(bf16)
    bp = pad2(params["bp"], 1, hp).astype(f32)
    wl = pad2(params["wl"], hp, hp).astype(bf16)
    bl = pad2(params["bl"], 1, hp).astype(f32)
    # fused GRU weights, gate order [r | z | n], each gate padded to hp lanes
    wi = jnp.concatenate([pad2(params["wih"][g], hp, hp) for g in range(3)],
                         axis=1).astype(bf16)                        # (hp, 3hp)
    wh = jnp.concatenate([pad2(params["whh"][g], hp, hp) for g in range(3)],
                         axis=1).astype(bf16)                        # (hp, 3hp)
    br = pad2(params["bih"][0] + params["bhh"][0], 1, hp).astype(f32)
    bz = pad2(params["bih"][1] + params["bhh"][1], 1, hp).astype(f32)
    bin_ = pad2(params["bih"][2], 1, hp).astype(f32)
    bhn = pad2(params["bhh"][2], 1, hp).astype(f32)
    wo = pad2(params["wo"], hp, out_pad).astype(bf16)
    bo = pad2(params["bo"], 1, out_pad).astype(f32)

    # --- VMEM budgeting: keep the whole adjacency resident when it fits ---
    weight_bytes = (2 * 2 * (wp.size + wl.size + wi.size + wh.size + wo.size)
                    + 2 * 4 * (bp.size + bl.size + br.size + bz.size
                               + bin_.size + bhn.size + bo.size))
    scratch_bytes = n_pad * hp * 4 + 2 * n_pad * hp * 2   # h (f32) + m ping-pong (bf16)
    tile_bytes = 2 * (tm * in_feats * 2 + tm * out_pad * 4 + tm * n_pad * 2)
    adj_full_bytes = 2 * n_pad * n_pad * 2                # double-buffered, bf16
    adj_resident = (adj_full_bytes + weight_bytes + scratch_bytes + tile_bytes
                    + (4 << 20)) <= vmem_budget_bytes

    const = lambda shape: pl.BlockSpec(shape, lambda s, j: (0, 0))
    # x is only consumed in phase 0, adj only in phases >= 1, out only in the
    # last phase: gating the block index on the phase keeps the resident block
    # unchanged in the other phases so no DMA / HBM writeback is issued there.
    x_spec = pl.BlockSpec((tm, in_feats),
                          lambda s, j: (jnp.where(s == 0, j, 0), 0))
    if adj_resident:
        adj_spec = pl.BlockSpec((n_pad, n_pad), lambda s, j: (0, 0))
    else:
        adj_spec = pl.BlockSpec((tm, n_pad),
                                lambda s, j: (jnp.where(s > 0, j, 0), 0))
    out_spec = pl.BlockSpec((tm, out_pad),
                            lambda s, j: (jnp.where(s == N_STEPS, j, 0), 0))

    flops = (2 * n_pad * in_feats * hp + 2 * n_pad * hp * out_pad
             + 2 * N_STEPS * n_pad * (n_pad * hp + 7 * hp * hp))
    transcendentals = 3 * N_STEPS * n_pad * hp
    adj_passes = 1 if adj_resident else N_STEPS
    bytes_accessed = (x_p.size * 2 + adj_p.size * 2 * adj_passes
                      + (wp.size + wl.size + wi.size + wh.size + wo.size) * 2
                      + (bp.size + bl.size + br.size + bz.size + bin_.size
                         + bhn.size + bo.size) * 4
                      + n_pad * out_pad * 4)

    kernel = functools.partial(_gatedgcn_kernel, tm=tm, hp=hp, n_steps=N_STEPS,
                               n_pad=n_pad, adj_resident=adj_resident)

    out = pl.pallas_call(
        kernel,
        out_shape=jax.ShapeDtypeStruct((n_pad, out_pad), f32),
        grid_spec=pltpu.PrefetchScalarGridSpec(
            num_scalar_prefetch=0,
            grid=(N_STEPS + 1, n_tiles),
            in_specs=[
                x_spec,                         # x (phase 0 only)
                adj_spec,                       # adj (resident or streamed)
                const((in_feats, hp)),          # wp
                const((1, hp)),                 # bp
                const((hp, hp)),                # wl
                const((1, hp)),                 # bl
                const((hp, 3 * hp)),            # wi (fused [r|z|n])
                const((hp, 3 * hp)),            # wh (fused [r|z|n])
                const((1, hp)),                 # b_r = b_ir + b_hr
                const((1, hp)),                 # b_z = b_iz + b_hz
                const((1, hp)),                 # b_in
                const((1, hp)),                 # b_hn
                const((hp, out_pad)),           # wo (lane-padded)
                const((1, out_pad)),            # bo (lane-padded)
            ],
            out_specs=out_spec,
            scratch_shapes=[
                pltpu.VMEM((n_pad, hp), f32),        # h for all nodes
                pltpu.VMEM((2 * n_pad, hp), bf16),   # messages, ping-pong by parity
            ],
        ),
        compiler_params=pltpu.CompilerParams(
            # tiles share the h/m scratch across phases -> keep both axes serial
            dimension_semantics=("arbitrary", "arbitrary"),
            vmem_limit_bytes=int(vmem_budget_bytes),
        ),
        cost_estimate=pl.CostEstimate(flops=int(flops),
                                      transcendentals=int(transcendentals),
                                      bytes_accessed=int(bytes_accessed)),
    )(x_p, adj_p, wp, bp, wl, bl, wi, wh, br, bz, bin_, bhn, wo, bo)

    return out[:n, :out_dim]


def reference_forward(x, adj, p):
    """Pure-JAX f32 reference matching the PyTorch/DGL semantics (eval mode)."""
    h = jnp.maximum(x @ p["wp"] + p["bp"], 0.0)
    for _ in range(N_STEPS):
        a = adj @ (h @ p["wl"] + p["bl"])
        r = jax.nn.sigmoid(a @ p["wih"][0] + p["bih"][0]
                           + h @ p["whh"][0] + p["bhh"][0])
        z = jax.nn.sigmoid(a @ p["wih"][1] + p["bih"][1]
                           + h @ p["whh"][1] + p["bhh"][1])
        n = jnp.tanh(a @ p["wih"][2] + p["bih"][2]
                     + r * (h @ p["whh"][2] + p["bhh"][2]))
        h = (1.0 - z) * n + z * h
    return h @ p["wo"] + p["bo"]


def init_params(key, in_feats, hidden, out_dim):
    ks = jax.random.split(key, 8)
    s = 0.1
    return {
        "wp": s * jax.random.normal(ks[0], (in_feats, hidden), jnp.float32),
        "bp": s * jax.random.normal(ks[1], (1, hidden), jnp.float32),
        "wl": s * jax.random.normal(ks[2], (hidden, hidden), jnp.float32),
        "bl": s * jax.random.normal(ks[3], (1, hidden), jnp.float32),
        # GRUCell weights, gate order [r, z, n], stored as x @ W
        "wih": s * jax.random.normal(ks[4], (3, hidden, hidden), jnp.float32),
        "bih": s * jax.random.normal(ks[5], (3, 1, hidden), jnp.float32),
        "whh": s * jax.random.normal(ks[6], (3, hidden, hidden), jnp.float32),
        "bhh": s * jax.random.normal(ks[7], (3, 1, hidden), jnp.float32),
        "wo": s * jax.random.normal(jax.random.fold_in(key, 99),
                                    (hidden, out_dim), jnp.float32),
        "bo": s * jax.random.normal(jax.random.fold_in(key, 100),
                                    (1, out_dim), jnp.float32),
    }


if __name__ == "__main__":
    key = jax.random.PRNGKey(0)

    n_nodes, in_feats, hidden, out_dim = 32, 16, 32, 4

    k_x, k_e, k_p = jax.random.split(key, 3)
    x = jax.random.normal(k_x, (n_nodes, in_feats), jnp.float32)

    # Deterministic random graph: 96 directed edges -> dense adjacency A[dst, src].
    n_edges = 96
    src = jax.random.randint(jax.random.fold_in(k_e, 0), (n_edges,), 0, n_nodes)
    dst = jax.random.randint(jax.random.fold_in(k_e, 1), (n_edges,), 0, n_nodes)
    adj = jnp.zeros((n_nodes, n_nodes), jnp.float32).at[dst, src].add(1.0)

    params = init_params(k_p, in_feats, hidden, out_dim)

    out = gatedgcn_forward(x, adj, params)
    out = jax.block_until_ready(out)

    ref = reference_forward(x, adj, params)
    assert out.shape == (n_nodes, out_dim)
    err = float(jnp.max(jnp.abs(out - ref)))
    assert jnp.allclose(out, ref, atol=5e-2, rtol=5e-2), f"max err {err}"

    print("KERNEL_OK")
</pallas_src>

<mosaic_0001>
module attributes {stable_mosaic.version = 11 : i64} {
  func.func @_gatedgcn_kernel(%arg0: i32, %arg1: i32, %arg2: memref<128x16xbf16, #tpu.memory_space<vmem>>, %arg3: memref<128x128xbf16, #tpu.memory_space<vmem>>, %arg4: memref<16x128xbf16, #tpu.memory_space<vmem>>, %arg5: memref<1x128xf32, #tpu.memory_space<vmem>>, %arg6: memref<128x128xbf16, #tpu.memory_space<vmem>>, %arg7: memref<1x128xf32, #tpu.memory_space<vmem>>, %arg8: memref<128x384xbf16, #tpu.memory_space<vmem>>, %arg9: memref<128x384xbf16, #tpu.memory_space<vmem>>, %arg10: memref<1x128xf32, #tpu.memory_space<vmem>>, %arg11: memref<1x128xf32, #tpu.memory_space<vmem>>, %arg12: memref<1x128xf32, #tpu.memory_space<vmem>>, %arg13: memref<1x128xf32, #tpu.memory_space<vmem>>, %arg14: memref<128x128xbf16, #tpu.memory_space<vmem>>, %arg15: memref<1x128xf32, #tpu.memory_space<vmem>>, %arg16: memref<128x128xf32, #tpu.memory_space<vmem>>, %arg17: memref<128x128xf32, #tpu.memory_space<vmem>>, %arg18: memref<256x128xbf16, #tpu.memory_space<vmem>>) attributes {dimension_semantics = [#tpu.dimension_semantics<arbitrary>, #tpu.dimension_semantics<arbitrary>], iteration_bounds = array<i64: 4, 1>, scalar_prefetch = 0 : i64, scratch_operands = 2 : i64, tpu.core_type = #tpu.core_type<tc>, window_params = [{transform_indices = @transform_0, window_bounds = array<i64: 128, 16>}, {pipeline_mode = #tpu.pipeline_mode<synchronous>, transform_indices = @transform_1, window_bounds = array<i64: 128, 128>}, {pipeline_mode = #tpu.pipeline_mode<synchronous>, transform_indices = @transform_2, window_bounds = array<i64: 16, 128>}, {pipeline_mode = #tpu.pipeline_mode<synchronous>, transform_indices = @transform_3, window_bounds = array<i64: 1, 128>}, {pipeline_mode = #tpu.pipeline_mode<synchronous>, transform_indices = @transform_4, window_bounds = array<i64: 128, 128>}, {pipeline_mode = #tpu.pipeline_mode<synchronous>, transform_indices = @transform_5, window_bounds = array<i64: 1, 128>}, {pipeline_mode = #tpu.pipeline_mode<synchronous>, transform_indices = @transform_6, window_bounds = array<i64: 128, 384>}, {pipeline_mode = #tpu.pipeline_mode<synchronous>, transform_indices = @transform_7, window_bounds = array<i64: 128, 384>}, {pipeline_mode = #tpu.pipeline_mode<synchronous>, transform_indices = @transform_8, window_bounds = array<i64: 1, 128>}, {pipeline_mode = #tpu.pipeline_mode<synchronous>, transform_indices = @transform_9, window_bounds = array<i64: 1, 128>}, {pipeline_mode = #tpu.pipeline_mode<synchronous>, transform_indices = @transform_10, window_bounds = array<i64: 1, 128>}, {pipeline_mode = #tpu.pipeline_mode<synchronous>, transform_indices = @transform_11, window_bounds = array<i64: 1, 128>}, {pipeline_mode = #tpu.pipeline_mode<synchronous>, transform_indices = @transform_12, window_bounds = array<i64: 128, 128>}, {pipeline_mode = #tpu.pipeline_mode<synchronous>, transform_indices = @transform_13, window_bounds = array<i64: 1, 128>}, {transform_indices = @transform_14, window_bounds = array<i64: 128, 128>}]} {
    %c128_i32 = arith.constant 128 : i32
    %0 = arith.muli %arg1, %c128_i32 : i32
    %1 = tpu.assume_multiple %0, 128 : i32
    %c0_i32 = arith.constant 0 : i32
    %2 = arith.cmpi eq, %arg0, %c0_i32 : i32
    %3 = arith.extui %2 : i1 to i32
    %c0_i32_0 = arith.constant 0 : i32
    %4 = arith.cmpi ne, %3, %c0_i32_0 : i32
    scf.if %4 {
      %c0 = arith.constant 0 : index
      %c0_3 = arith.constant 0 : index
      %8 = vector.load %arg2[%c0, %c0_3] : memref<128x16xbf16, #tpu.memory_space<vmem>>, vector<128x16xbf16>
      %c0_4 = arith.constant 0 : index
      %c0_5 = arith.constant 0 : index
      %9 = vector.load %arg4[%c0_4, %c0_5] : memref<16x128xbf16, #tpu.memory_space<vmem>>, vector<16x128xbf16>
      %cst = arith.constant dense<0.000000e+00> : vector<128x128xf32>
      %10 = tpu.matmul %8, %9, %cst {dimension_numbers = #tpu.dot_dimension_numbers<[1], [0], [0], [1], [0, 0, 1, 1], [], []>} : vector<128x16xbf16>, vector<16x128xbf16>, vector<128x128xf32> -> vector<128x128xf32>
      %c0_6 = arith.constant 0 : index
      %c0_7 = arith.constant 0 : index
      %11 = vector.load %arg5[%c0_6, %c0_7] : memref<1x128xf32, #tpu.memory_space<vmem>>, vector<1x128xf32>
      %12 = vector.broadcast %11 : vector<1x128xf32> to vector<128x128xf32>
      %13 = arith.addf %10, %12 : vector<128x128xf32>
      %cst_8 = arith.constant 0.000000e+00 : f32
      %14 = vector.broadcast %cst_8 : f32 to vector<128x128xf32>
      %15 = arith.maximumf %13, %14 : vector<128x128xf32>
      %16 = arith.index_cast %1 : i32 to index
      %c0_9 = arith.constant 0 : index
      %17 = vector.load %arg17[%16, %c0_9] : memref<128x128xf32, #tpu.memory_space<vmem>>, vector<128x128xf32>
      tpu.vector_store %arg17[%16, %c0_9], %15 {strides = array<i32>} : memref<128x128xf32, #tpu.memory_space<vmem>>, vector<128x128xf32>,
      %18 = arith.truncf %15 : vector<128x128xf32> to vector<128x128xbf16>
      %c0_10 = arith.constant 0 : index
      %c0_11 = arith.constant 0 : index
      %19 = vector.load %arg6[%c0_10, %c0_11] : memref<128x128xbf16, #tpu.memory_space<vmem>>, vector<128x128xbf16>
      %cst_12 = arith.constant dense<0.000000e+00> : vector<128x128xf32>
      %20 = tpu.matmul %18, %19, %cst_12 {dimension_numbers = #tpu.dot_dimension_numbers<[1], [0], [0], [1], [0, 0, 1, 1], [], []>} : vector<128x128xbf16>, vector<128x128xbf16>, vector<128x128xf32> -> vector<128x128xf32>
      %c0_13 = arith.constant 0 : index
      %c0_14 = arith.constant 0 : index
      %21 = vector.load %arg7[%c0_13, %c0_14] : memref<1x128xf32, #tpu.memory_space<vmem>>, vector<1x128xf32>
      %22 = vector.broadcast %21 : vector<1x128xf32> to vector<128x128xf32>
      %23 = arith.addf %20, %22 : vector<128x128xf32>
      %24 = arith.truncf %23 : vector<128x128xf32> to vector<128x128xbf16>
      %25 = arith.index_cast %1 : i32 to index
      %c0_15 = arith.constant 0 : index
      %26 = vector.load %arg18[%25, %c0_15] : memref<256x128xbf16, #tpu.memory_space<vmem>>, vector<128x128xbf16>
      tpu.vector_store %arg18[%25, %c0_15], %24 {strides = array<i32>} : memref<256x128xbf16, #tpu.memory_space<vmem>>, vector<128x128xbf16>,
    } else {
    }
    %c0_i32_1 = arith.constant 0 : i32
    %5 = arith.cmpi sgt, %arg0, %c0_i32_1 : i32
    %6 = arith.extui %5 : i1 to i32
    %c0_i32_2 = arith.constant 0 : i32
    %7 = arith.cmpi ne, %6, %c0_i32_2 : i32
    scf.if %7 {
      %c1_i32 = arith.constant 1 : i32
      %8 = arith.addi %arg0, %c1_i32 : i32
      %c2_i32 = arith.constant 2 : i32
      %c0_i32_3 = arith.constant 0 : i32
      %9 = arith.cmpi eq, %c2_i32, %c0_i32_3 : i32
      %c1_i32_4 = arith.constant 1 : i32
      %10 = arith.select %9, %c1_i32_4, %c2_i32 : i32
      %11 = arith.remsi %8, %10 : i32
      %c0_i32_5 = arith.constant 0 : i32
      %12 = arith.cmpi ne, %11, %c0_i32_5 : i32
      %c0_i32_6 = arith.constant 0 : i32
      %13 = arith.cmpi slt, %11, %c0_i32_6 : i32
      %c0_i32_7 = arith.constant 0 : i32
      %14 = arith.cmpi slt, %10, %c0_i32_7 : i32
      %15 = arith.xori %13, %14 : i1
      %16 = arith.andi %15, %12 : i1
      %17 = arith.addi %11, %10 : i32
      %18 = arith.select %16, %17, %11 : i32
      %c128_i32_8 = arith.constant 128 : i32
      %19 = arith.muli %18, %c128_i32_8 : i32
      %20 = tpu.assume_multiple %19, 128 : i32
      %c2_i32_9 = arith.constant 2 : i32
      %c0_i32_10 = arith.constant 0 : i32
      %21 = arith.cmpi eq, %c2_i32_9, %c0_i32_10 : i32
      %c1_i32_11 = arith.constant 1 : i32
      %22 = arith.select %21, %c1_i32_11, %c2_i32_9 : i32
      %23 = arith.remsi %arg0, %22 : i32
      %c0_i32_12 = arith.constant 0 : i32
      %24 = arith.cmpi ne, %23, %c0_i32_12 : i32
      %c0_i32_13 = arith.constant 0 : i32
      %25 = arith.cmpi slt, %23, %c0_i32_13 : i32
      %c0_i32_14 = arith.constant 0 : i32
      %26 = arith.cmpi slt, %22, %c0_i32_14 : i32
      %27 = arith.xori %25, %26 : i1
      %28 = arith.andi %27, %24 : i1
      %29 = arith.addi %23, %22 : i32
      %30 = arith.select %28, %29, %23 : i32
      %c128_i32_15 = arith.constant 128 : i32
      %31 = arith.muli %30, %c128_i32_15 : i32
      %32 = arith.addi %31, %1 : i32
      %33 = tpu.assume_multiple %32, 128 : i32
      %34 = arith.index_cast %20 : i32 to index
      %c0 = arith.constant 0 : index
      %35 = vector.load %arg18[%34, %c0] : memref<256x128xbf16, #tpu.memory_space<vmem>>, vector<128x128xbf16>
      %36 = arith.index_cast %1 : i32 to index
      %c0_16 = arith.constant 0 : index
      %37 = vector.load %arg3[%36, %c0_16] : memref<128x128xbf16, #tpu.memory_space<vmem>>, vector<128x128xbf16>
      %cst = arith.constant dense<0.000000e+00> : vector<128x128xf32>
      %38 = tpu.matmul %37, %35, %cst {dimension_numbers = #tpu.dot_dimension_numbers<[1], [0], [0], [1], [0, 0, 1, 1], [], []>} : vector<128x128xbf16>, vector<128x128xbf16>, vector<128x128xf32> -> vector<128x128xf32>
      %39 = arith.index_cast %1 : i32 to index
      %c0_17 = arith.constant 0 : index
      %40 = vector.load %arg17[%39, %c0_17] : memref<128x128xf32, #tpu.memory_space<vmem>>, vector<128x128xf32>
      %41 = arith.truncf %38 : vector<128x128xf32> to vector<128x128xbf16>
      %c0_18 = arith.constant 0 : index
      %c0_19 = arith.constant 0 : index
      %42 = vector.load %arg8[%c0_18, %c0_19] : memref<128x384xbf16, #tpu.memory_space<vmem>>, vector<128x384xbf16>
      %cst_20 = arith.constant dense<0.000000e+00> : vector<128x384xf32>
      %43 = tpu.matmul %41, %42, %cst_20 {dimension_numbers = #tpu.dot_dimension_numbers<[1], [0], [0], [1], [0, 0, 1, 1], [], []>} : vector<128x128xbf16>, vector<128x384xbf16>, vector<128x384xf32> -> vector<128x384xf32>
      %44 = arith.truncf %40 : vector<128x128xf32> to vector<128x128xbf16>
      %c0_21 = arith.constant 0 : index
      %c0_22 = arith.constant 0 : index
      %45 = vector.load %arg9[%c0_21, %c0_22] : memref<128x384xbf16, #tpu.memory_space<vmem>>, vector<128x384xbf16>
      %cst_23 = arith.constant dense<0.000000e+00> : vector<128x384xf32>
      %46 = tpu.matmul %44, %45, %cst_23 {dimension_numbers = #tpu.dot_dimension_numbers<[1], [0], [0], [1], [0, 0, 1, 1], [], []>} : vector<128x128xbf16>, vector<128x384xbf16>, vector<128x384xf32> -> vector<128x384xf32>
      %47 = vector.extract_strided_slice %43 {offsets = [0, 0], sizes = [128, 128], strides = [1, 1]} : vector<128x384xf32> to vector<128x128xf32>
      %48 = vector.extract_strided_slice %46 {offsets = [0, 0], sizes = [128, 128], strides = [1, 1]} : vector<128x384xf32> to vector<128x128xf32>
      %49 = arith.addf %47, %48 : vector<128x128xf32>
      %c0_24 = arith.constant 0 : index
      %c0_25 = arith.constant 0 : index
      %50 = vector.load %arg10[%c0_24, %c0_25] : memref<1x128xf32, #tpu.memory_space<vmem>>, vector<1x128xf32>
      %51 = vector.broadcast %50 : vector<1x128xf32> to vector<128x128xf32>
      %52 = arith.addf %49, %51 : vector<128x128xf32>
      %53 = arith.negf %52 : vector<128x128xf32>
      %54 = math.exp %53 : vector<128x128xf32>
      %cst_26 = arith.constant 1.000000e+00 : f32
      %55 = vector.broadcast %cst_26 : f32 to vector<128x128xf32>
      %56 = arith.addf %55, %54 : vector<128x128xf32>
      %57 = arith.divf %55, %56 : vector<128x128xf32>
      %58 = vector.extract_strided_slice %43 {offsets = [0, 128], sizes = [128, 128], strides = [1, 1]} : vector<128x384xf32> to vector<128x128xf32>
      %59 = vector.extract_strided_slice %46 {offsets = [0, 128], sizes = [128, 128], strides = [1, 1]} : vector<128x384xf32> to vector<128x128xf32>
      %60 = arith.addf %58, %59 : vector<128x128xf32>
      %c0_27 = arith.constant 0 : index
      %c0_28 = arith.constant 0 : index
      %61 = vector.load %arg11[%c0_27, %c0_28] : memref<1x128xf32, #tpu.memory_space<vmem>>, vector<1x128xf32>
      %62 = vector.broadcast %61 : vector<1x128xf32> to vector<128x128xf32>
      %63 = arith.addf %60, %62 : vector<128x128xf32>
      %64 = arith.negf %63 : vector<128x128xf32>
      %65 = math.exp %64 : vector<128x128xf32>
      %cst_29 = arith.constant 1.000000e+00 : f32
      %66 = vector.broadcast %cst_29 : f32 to vector<128x128xf32>
      %67 = arith.addf %66, %65 : vector<128x128xf32>
      %68 = arith.divf %66, %67 : vector<128x128xf32>
      %69 = vector.extract_strided_slice %43 {offsets = [0, 256], sizes = [128, 128], strides = [1, 1]} : vector<128x384xf32> to vector<128x128xf32>
      %c0_30 = arith.constant 0 : index
      %c0_31 = arith.constant 0 : index
      %70 = vector.load %arg12[%c0_30, %c0_31] : memref<1x128xf32, #tpu.memory_space<vmem>>, vector<1x128xf32>
      %71 = vector.broadcast %70 : vector<1x128xf32> to vector<128x128xf32>
      %72 = arith.addf %69, %71 : vector<128x128xf32>
      %73 = vector.extract_strided_slice %46 {offsets = [0, 256], sizes = [128, 128], strides = [1, 1]} : vector<128x384xf32> to vector<128x128xf32>
      %c0_32 = arith.constant 0 : index
      %c0_33 = arith.constant 0 : index
      %74 = vector.load %arg13[%c0_32, %c0_33] : memref<1x128xf32, #tpu.memory_space<vmem>>, vector<1x128xf32>
      %75 = vector.broadcast %74 : vector<1x128xf32> to vector<128x128xf32>
      %76 = arith.addf %73, %75 : vector<128x128xf32>
      %77 = arith.mulf %57, %76 : vector<128x128xf32>
      %78 = arith.addf %72, %77 : vector<128x128xf32>
      %79 = math.tanh %78 : vector<128x128xf32>
      %cst_34 = arith.constant 1.000000e+00 : f32
      %80 = vector.broadcast %cst_34 : f32 to vector<128x128xf32>
      %81 = arith.subf %80, %68 : vector<128x128xf32>
      %82 = arith.mulf %81, %79 : vector<128x128xf32>
      %83 = arith.mulf %68, %40 : vector<128x128xf32>
      %84 = arith.addf %82, %83 : vector<128x128xf32>
      %85 = arith.index_cast %1 : i32 to index
      %c0_35 = arith.constant 0 : index
      %86 = vector.load %arg17[%85, %c0_35] : memref<128x128xf32, #tpu.memory_space<vmem>>, vector<128x128xf32>
      tpu.vector_store %arg17[%85, %c0_35], %84 {strides = array<i32>} : memref<128x128xf32, #tpu.memory_space<vmem>>, vector<128x128xf32>,
      %c3_i32 = arith.constant 3 : i32
      %87 = arith.cmpi slt, %arg0, %c3_i32 : i32
      %88 = arith.extui %87 : i1 to i32
      %c0_i32_36 = arith.constant 0 : i32
      %89 = arith.cmpi ne, %88, %c0_i32_36 : i32
      scf.if %89 {
        %93 = arith.truncf %84 : vector<128x128xf32> to vector<128x128xbf16>
        %c0_39 = arith.constant 0 : index
        %c0_40 = arith.constant 0 : index
        %94 = vector.load %arg6[%c0_39, %c0_40] : memref<128x128xbf16, #tpu.memory_space<vmem>>, vector<128x128xbf16>
        %cst_41 = arith.constant dense<0.000000e+00> : vector<128x128xf32>
        %95 = tpu.matmul %93, %94, %cst_41 {dimension_numbers = #tpu.dot_dimension_numbers<[1], [0], [0], [1], [0, 0, 1, 1], [], []>} : vector<128x128xbf16>, vector<128x128xbf16>, vector<128x128xf32> -> vector<128x128xf32>
        %c0_42 = arith.constant 0 : index
        %c0_43 = arith.constant 0 : index
        %96 = vector.load %arg7[%c0_42, %c0_43] : memref<1x128xf32, #tpu.memory_space<vmem>>, vector<1x128xf32>
        %97 = vector.broadcast %96 : vector<1x128xf32> to vector<128x128xf32>
        %98 = arith.addf %95, %97 : vector<128x128xf32>
        %99 = arith.truncf %98 : vector<128x128xf32> to vector<128x128xbf16>
        %100 = arith.index_cast %33 : i32 to index
        %c0_44 = arith.constant 0 : index
        %101 = vector.load %arg18[%100, %c0_44] : memref<256x128xbf16, #tpu.memory_space<vmem>>, vector<128x128xbf16>
        tpu.vector_store %arg18[%100, %c0_44], %99 {strides = array<i32>} : memref<256x128xbf16, #tpu.memory_space<vmem>>, vector<128x128xbf16>,
      } else {
      }
      %c3_i32_37 = arith.constant 3 : i32
      %90 = arith.cmpi eq, %arg0, %c3_i32_37 : i32
      %91 = arith.extui %90 : i1 to i32
      %c0_i32_38 = arith.constant 0 : i32
      %92 = arith.cmpi ne, %91, %c0_i32_38 : i32
      scf.if %92 {
        %93 = arith.truncf %84 : vector<128x128xf32> to vector<128x128xbf16>
        %c0_39 = arith.constant 0 : index
        %c0_40 = arith.constant 0 : index
        %94 = vector.load %arg14[%c0_39, %c0_40] : memref<128x128xbf16, #tpu.memory_space<vmem>>, vector<128x128xbf16>
        %cst_41 = arith.constant dense<0.000000e+00> : vector<128x128xf32>
        %95 = tpu.matmul %93, %94, %cst_41 {dimension_numbers = #tpu.dot_dimension_numbers<[1], [0], [0], [1], [0, 0, 1, 1], [], []>} : vector<128x128xbf16>, vector<128x128xbf16>, vector<128x128xf32> -> vector<128x128xf32>
        %c0_42 = arith.constant 0 : index
        %c0_43 = arith.constant 0 : index
        %96 = vector.load %arg15[%c0_42, %c0_43] : memref<1x128xf32, #tpu.memory_space<vmem>>, vector<1x128xf32>
        %97 = vector.broadcast %96 : vector<1x128xf32> to vector<128x128xf32>
        %98 = arith.addf %95, %97 : vector<128x128xf32>
        %c0_44 = arith.constant 0 : index
        %c0_45 = arith.constant 0 : index
        %99 = vector.load %arg16[%c0_44, %c0_45] : memref<128x128xf32, #tpu.memory_space<vmem>>, vector<128x128xf32>
        tpu.vector_store %arg16[%c0_44, %c0_45], %98 {strides = array<i32>} : memref<128x128xf32, #tpu.memory_space<vmem>>, vector<128x128xf32>,
      } else {
      }
    } else {
    }
    return
  }
  func.func @transform_0(%arg0: i32, %arg1: i32) -> (i32, i32) {
    %c0_i32 = arith.constant 0 : i32
    %0 = arith.cmpi eq, %arg0, %c0_i32 : i32
    %c0_i32_0 = arith.constant 0 : i32
    %1 = arith.select %0, %arg1, %c0_i32_0 : i32
    %c0_i32_1 = arith.constant 0 : i32
    %c0_i32_2 = arith.constant 0 : i32
    return %1, %c0_i32_1 : i32, i32
  }
  func.func @transform_1(%arg0: i32, %arg1: i32) -> (i32, i32) {
    %c0_i32 = arith.constant 0 : i32
    %c0_i32_0 = arith.constant 0 : i32
    %c0_i32_1 = arith.constant 0 : i32
    return %c0_i32, %c0_i32_0 : i32, i32
  }
  func.func @transform_2(%arg0: i32, %arg1: i32) -> (i32, i32) {
    %c0_i32 = arith.constant 0 : i32
    %c0_i32_0 = arith.constant 0 : i32
    %c0_i32_1 = arith.constant 0 : i32
    return %c0_i32, %c0_i32_0 : i32, i32
  }
  func.func @transform_3(%arg0: i32, %arg1: i32) -> (i32, i32) {
    %c0_i32 = arith.constant 0 : i32
    %c0_i32_0 = arith.constant 0 : i32
    %c0_i32_1 = arith.constant 0 : i32
    return %c0_i32, %c0_i32_0 : i32, i32
  }
  func.func @transform_4(%arg0: i32, %arg1: i32) -> (i32, i32) {
    %c0_i32 = arith.constant 0 : i32
    %c0_i32_0 = arith.constant 0 : i32
    %c0_i32_1 = arith.constant 0 : i32
    return %c0_i32, %c0_i32_0 : i32, i32
  }
  func.func @transform_5(%arg0: i32, %arg1: i32) -> (i32, i32) {
    %c0_i32 = arith.constant 0 : i32
    %c0_i32_0 = arith.constant 0 : i32
    %c0_i32_1 = arith.constant 0 : i32
    return %c0_i32, %c0_i32_0 : i32, i32
  }
  func.func @transform_6(%arg0: i32, %arg1: i32) -> (i32, i32) {
    %c0_i32 = arith.constant 0 : i32
    %c0_i32_0 = arith.constant 0 : i32
    %c0_i32_1 = arith.constant 0 : i32
    return %c0_i32, %c0_i32_0 : i32, i32
  }
  func.func @transform_7(%arg0: i32, %arg1: i32) -> (i32, i32) {
    %c0_i32 = arith.constant 0 : i32
    %c0_i32_0 = arith.constant 0 : i32
    %c0_i32_1 = arith.constant 0 : i32
    return %c0_i32, %c0_i32_0 : i32, i32
  }
  func.func @transform_8(%arg0: i32, %arg1: i32) -> (i32, i32) {
    %c0_i32 = arith.constant 0 : i32
    %c0_i32_0 = arith.constant 0 : i32
    %c0_i32_1 = arith.constant 0 : i32
    return %c0_i32, %c0_i32_0 : i32, i32
  }
  func.func @transform_9(%arg0: i32, %arg1: i32) -> (i32, i32) {
    %c0_i32 = arith.constant 0 : i32
    %c0_i32_0 = arith.constant 0 : i32
    %c0_i32_1 = arith.constant 0 : i32
    return %c0_i32, %c0_i32_0 : i32, i32
  }
  func.func @transform_10(%arg0: i32, %arg1: i32) -> (i32, i32) {
    %c0_i32 = arith.constant 0 : i32
    %c0_i32_0 = arith.constant 0 : i32
    %c0_i32_1 = arith.constant 0 : i32
    return %c0_i32, %c0_i32_0 : i32, i32
  }
  func.func @transform_11(%arg0: i32, %arg1: i32) -> (i32, i32) {
    %c0_i32 = arith.constant 0 : i32
    %c0_i32_0 = arith.constant 0 : i32
    %c0_i32_1 = arith.constant 0 : i32
    return %c0_i32, %c0_i32_0 : i32, i32
  }
  func.func @transform_12(%arg0: i32, %arg1: i32) -> (i32, i32) {
    %c0_i32 = arith.constant 0 : i32
    %c0_i32_0 = arith.constant 0 : i32
    %c0_i32_1 = arith.constant 0 : i32
    return %c0_i32, %c0_i32_0 : i32, i32
  }
  func.func @transform_13(%arg0: i32, %arg1: i32) -> (i32, i32) {
    %c0_i32 = arith.constant 0 : i32
    %c0_i32_0 = arith.constant 0 : i32
    %c0_i32_1 = arith.constant 0 : i32
    return %c0_i32, %c0_i32_0 : i32, i32
  }
  func.func @transform_14(%arg0: i32, %arg1: i32) -> (i32, i32) {
    %c3_i32 = arith.constant 3 : i32
    %0 = arith.cmpi eq, %arg0, %c3_i32 : i32
    %c0_i32 = arith.constant 0 : i32
    %1 = arith.select %0, %arg1, %c0_i32 : i32
    %c0_i32_0 = arith.constant 0 : i32
    %c0_i32_1 = arith.constant 0 : i32
    return %1, %c0_i32_0 : i32, i32
  }
}

</mosaic_0001>

<bundles_post_ra>
// kernel: gatedgcn_forward.1
= control target key start
LH: loop header
LB: loop body
LE: loop exit
PB: predicated region body
PF: predicated region fallthrough
CT: control target
= control target key end

     0   :  { %s4117_s29 = smov 0   ;;  %s4119_s30 = smov 0   ;;  %s4928_s0 = inlined_call_operand.vmem [shape: bf16[128,16], index: 0, kind: input, shape index: {}]   ;;  %s4929_s1 = inlined_call_operand.vmem [shape: bf16[128,128], index: 1, kind: input, shape index: {}]   ;;  %s4930_s2 = inlined_call_operand.vmem [shape: bf16[16,128], index: 2, kind: input, shape index: {}]   ;;  %s4931_s3 = inlined_call_operand.vmem [shape: f32[1,128], index: 3, kind: input, shape index: {}]   ;;  %s4932_s4 = inlined_call_operand.vmem [shape: bf16[128,128], index: 4, kind: input, shape index: {}]   ;;  %s4933_s5 = inlined_call_operand.vmem [shape: f32[1,128], index: 5, kind: input, shape index: {}]   ;;  %s4934_s6 = inlined_call_operand.vmem [shape: bf16[128,384], index: 6, kind: input, shape index: {}]   ;;  %s4935_s7 = inlined_call_operand.vmem [shape: bf16[128,384], index: 7, kind: input, shape index: {}]   ;;  %s4936_s8 = inlined_call_operand.vmem [shape: f32[1,128], index: 8, kind: input, shape index: {}]   ;;  %s4937_s9 = inlined_call_operand.vmem [shape: f32[1,128], index: 9, kind: input, shape index: {}]   ;;  %s4938_s10 = inlined_call_operand.vmem [shape: f32[1,128], index: 10, kind: input, shape index: {}]   ;;  %s4939_s11 = inlined_call_operand.vmem [shape: f32[1,128], index: 11, kind: input, shape index: {}]   ;;  %s4940_s12 = inlined_call_operand.vmem [shape: bf16[128,128], index: 12, kind: input, shape index: {}]   ;;  %s4941_s13 = inlined_call_operand.vmem [shape: f32[1,128], index: 13, kind: input, shape index: {}]   ;;  %s4942_s14 = inlined_call_operand.vmem [shape: f32[128,128], index: 14, kind: output, shape index: {}]  }
   0x1   :  { %4945 = sst [smem:[#allocation9_spill]] %s4928_s0  ;;  %s4121_s15 = smov 0  }
   0x2   :  { %4946 = sst [smem:[#allocation10_spill]] %s4930_s2 }
   0x3 LB: > { %s36_s16 = sadd.s32 1, %s4035_s30  ;;  %p3029_p0 = scmp.ge.s32.totalorder %s4039_s15, 1  ;;  %s4039_s15 = sphi %s4121_s15, %s24_s15   ;;  %s4035_s30 = sphi %s4119_s30, %s4960_s30   ;;  %s4031_s29 = sphi %s4117_s29, %s4959_s29  }
   0x4   : > { %p38_p1 = scmp.ge.s32.totalorder %s36_s16, 4  ;;  %p437_p2 = scmp.lt.s32.totalorder %s4039_s15, 5 }
   0x6   : > { %s4962_s16 = smov (%p38_p1, %s36_s16), 0  ;;  %p438_p3 = pnand %p3029_p0, %p437_p2 }
   0x7   : > { %p3030_p4 = scmp.ne.s32.totalorder (!%p438_p3), %s4031_s29, 0 }
   0x8   : > { %441 = sbr.rel (%p438_p3) target bundleno = 1564 (0x61c), region = 76 }
   0xd   : > { %512 = sbr.rel (%p3030_p4) target bundleno = 458 (0x1ca), region = 80  ;;  %s4947_s2 = sld [smem:[#allocation10_spill]] (!%p3030_p4) }
   0xe   : > { %s4948_s0 = sld [smem:[#allocation9_spill]] (!%p3030_p4) }
  0x12   : > { %vm584_vm0 = vcmask 130048   ;;  %v3748_v5 = vld [vmem:[%s4932_s4 + $0x38] sm:$0xff]   ;;  %v3749_v6 = vld [vmem:[%s4932_s4 + $0x30] sm:$0xff]   ;;  %v3750_v8 = vld [vmem:[%s4932_s4 + $0x28] sm:$0xff]  }
  0x13   : > { %v3739_v0 = vld [vmem:[%s4947_s2] sm:$0xff]   ;;  %3666 = vmatprep.subr.bf16.mxu1 %v3748_v5  ;;  %v3752_v12 = vld [vmem:[%s4932_s4 + $0x18] sm:$0xff]   ;;  %v3753_v14 = vld [vmem:[%s4932_s4 + $0x10] sm:$0xff]  }
  0x14   : > { %v3740_v1 = vld [vmem:[%s4948_s0] sm:$0xff]   ;;  %3456 = vmatprep.subr.bf16.mxu0 %v3739_v0  ;;  %v3741_v2 = vld [vmem:[%s4948_s0 + $0x8] sm:$0xff]   ;;  %v3742_v3 = vld [vmem:[%s4948_s0 + $0x10] sm:$0xff]   ;;  %3674 = vmatpush3.bf16.msra.mxu1 %v3748_v5 }
  0x15   : > { %3457 = vmatpush3.bf16.msra.mxu0 %v3739_v0  ;;  %3458 = vmatprep.mubr.msk.bf16.mxu0 %vm584_vm0, %v3740_v1  ;;  %v3743_v4 = vld [vmem:[%s4948_s0 + $0x18] sm:$0xff]   ;;  %v3744_v7 = vld [vmem:[%s4948_s0 + $0x20] sm:$0xff]   ;;  %v3745_v10 = vld [vmem:[%s4948_s0 + $0x28] sm:$0xff]  }
  0x16   : > { %3474 = vmatprep.subr.bf16.mxu0 %v3748_v5  ;;  %3667 = vmatprep.subr.bf16.mxu1 %v3749_v6  ;;  %v3751_v9 = vld [vmem:[%s4932_s4 + $0x20] sm:$0xff]   ;;  %v3746_v11 = vld [vmem:[%s4948_s0 + $0x30] sm:$0xff]   ;;  %v3747_v13 = vld [vmem:[%s4948_s0 + $0x38] sm:$0xff]  }
  0x17   : > { %v3754_v15 = vld [vmem:[%s4932_s4 + $0x8] sm:$0xff]   ;;  %v3755_v16 = vld [vmem:[%s4932_s4] sm:$0xff]  }
  0x18   : > { %3459 = vmatmul.mubr.msk.bf16.vlgmr.msra.gmra.mxu0 %vm584_vm0, %v3741_v2  ;;  %3675 = vmatpush3.bf16.msra.mxu1 %v3749_v6  ;;  %v4200_v17 = vld [vmem:[%s4931_s3] ss:$0 sm:$0xff] }
  0x19   : > { %3462 = vmatprep.mubr.msk.bf16.mxu0 %vm584_vm0, %v3742_v3  ;;  %3475 = vmatpush3.bf16.msra.mxu0 %v3748_v5 }
  0x1a   : > { %3476 = vmatprep.subr.bf16.mxu0 %v3749_v6  ;;  %3668 = vmatprep.subr.bf16.mxu1 %v3750_v8 }
  0x1c   : > { %3676 = vmatpush3.bf16.msra.mxu1 %v3750_v8 }
  0x1d   : > { %3477 = vmatpush3.bf16.msra.mxu0 %v3749_v6  ;;  %3669 = vmatprep.subr.bf16.mxu1 %v3751_v9 }
  0x1e   : > { %3478 = vmatprep.subr.bf16.mxu0 %v3750_v8 }
  0x20   : > { %3463 = vmatmul.mubr.msk.bf16.gmra.mxu0 %vm584_vm0, %v3743_v4  ;;  %3677 = vmatpush3.bf16.msra.mxu1 %v3751_v9 }
  0x21   : > { %3466 = vmatprep.mubr.msk.bf16.mxu0 %vm584_vm0, %v3744_v7  ;;  %3479 = vmatpush3.bf16.msra.mxu0 %v3750_v8 }
  0x22   : > { %3480 = vmatprep.subr.bf16.mxu0 %v3751_v9  ;;  %3670 = vmatprep.subr.bf16.mxu1 %v3752_v12 }
  0x24   : > { %3678 = vmatpush3.bf16.msra.mxu1 %v3752_v12 }
  0x25   : > { %3481 = vmatpush3.bf16.msra.mxu0 %v3751_v9  ;;  %3671 = vmatprep.subr.bf16.mxu1 %v3753_v14 }
  0x26   : > { %3482 = vmatprep.subr.bf16.mxu0 %v3752_v12 }
  0x28   : > { %3467 = vmatmul.mubr.msk.bf16.gmra.mxu0 %vm584_vm0, %v3745_v10  ;;  %3679 = vmatpush3.bf16.msra.mxu1 %v3753_v14 }
  0x29   : > { %3470 = vmatprep.mubr.msk.bf16.mxu0 %vm584_vm0, %v3746_v11  ;;  %3483 = vmatpush3.bf16.msra.mxu0 %v3752_v12  ;;  %v3049_v11 = vld [vmem:[%s4933_s5] ss:$0 sm:$0xff] }
  0x2a   : > { %3484 = vmatprep.subr.bf16.mxu0 %v3753_v14  ;;  %3672 = vmatprep.subr.bf16.mxu1 %v3754_v15 }
  0x2c   : > { %3680 = vmatpush3.bf16.msra.mxu1 %v3754_v15 }
  0x2d   : > { %3485 = vmatpush3.bf16.msra.mxu0 %v3753_v14  ;;  %3673 = vmatprep.subr.bf16.mxu1 %v3755_v16 }
  0x2e   : > { %3486 = vmatprep.subr.bf16.mxu0 %v3754_v15 }
  0x30   : > { %3471 = vmatmul.mubr.msk.bf16.gmra.mxu0 %vm584_vm0, %v3747_v13  ;;  %3681 = vmatpush3.bf16.msra.mxu1 %v3755_v16 }
  0x31   : > { %3487 = vmatpush3.bf16.msra.mxu0 %v3754_v15 }
  0x32   : > { %3488 = vmatprep.subr.bf16.mxu0 %v3755_v16 }
  0x35   : > { %3489 = vmatpush3.bf16.msra.mxu0 %v3755_v16 }
  0xd8   : > { %v3460_v18 = vpop.f32.mrf.mxu0 }
  0xd9   : > { %v652_v19 = vadd.f32 %v3460_v18, %v4200_v17 }
  0xda   : > { %v643_v20 = vpop.f32.mrf.mxu0 }
  0xdb   : > { %v708_v21 = vmax.f32 %v652_v19, 0.0  ;;  %v644_v22 = vadd.f32 %v4200_v17, %v643_v20 }
  0xdc   : > { %v3461_v23 = vpop.f32.mrf.mxu0 }
  0xdd   : > { %725 = vst [vmem:[#allocation2 + $0x58] sm:$0xff] %v708_v21  ;;  %v706_v24 = vmax.f32 %v644_v22, 0.0  ;;  %v655_v25 = vadd.f32 %v3461_v23, %v4200_v17 }
  0xde   : > { %v646_v26 = vpop.f32.mrf.mxu0 }
  0xdf   : > { %723 = vst [vmem:[#allocation2 + $0x30] sm:$0xff] %v706_v24  ;;  %v709_v27 = vmax.f32 %v655_v25, 0.0  ;;  %v647_v28 = vadd.f32 %v4200_v17, %v646_v26 }
  0xe0   : > { %v3464_v29 = vpop.f32.mrf.mxu0 }
  0xe1   : > { %726 = vst [vmem:[#allocation2 + $0x18] sm:$0xff] %v709_v27  ;;  %v707_v30 = vmax.f32 %v647_v28, 0.0  ;;  %v668_v31 = vadd.f32 %v3464_v29, %v4200_v17  ;;  %v740_v36 = vpack.c.bf16 %v709_v27, %v708_v21 }
  0xe2   : > { %v659_v32 = vpop.f32.mrf.mxu0 }
  0xe3   : > { %724 = vst [vmem:[#allocation2] sm:$0xff] %v707_v30  ;;  %v739_v33 = vpack.c.bf16 %v707_v30, %v706_v24  ;;  %v712_v34 = vmax.f32 %v668_v31, 0.0  ;;  %v660_v35 = vadd.f32 %v4200_v17, %v659_v32 }
  0xe4   : > { %v3465_v37 = vpop.f32.mrf.mxu0 }
  0xe5   : > { %729 = vst [vmem:[#allocation2 + $0x8] sm:$0xff] %v712_v34  ;;  %v710_v38 = vmax.f32 %v660_v35, 0.0  ;;  %v671_v39 = vadd.f32 %v3465_v37, %v4200_v17  ;;  %3490 = vmatprep.mubr.bf16.mxu0 %v739_v33 }
  0xe6   : > { %v662_v40 = vpop.f32.mrf.mxu0  ;;  %3491 = vmatmul.mubr.bf16.vlgmr.msra.gmra.mxu0 %v740_v36 }
  0xe7   : > { %727 = vst [vmem:[#allocation2 + $0x50] sm:$0xff] %v710_v38  ;;  %v713_v41 = vmax.f32 %v671_v39, 0.0  ;;  %v663_v42 = vadd.f32 %v4200_v17, %v662_v40 }
  0xe8   : > { %v3468_v43 = vpop.f32.mrf.mxu0 }
  0xe9   : > { %730 = vst [vmem:[#allocation2 + $0x48] sm:$0xff] %v713_v41  ;;  %v711_v44 = vmax.f32 %v663_v42, 0.0  ;;  %v684_v45 = vadd.f32 %v3468_v43, %v4200_v17  ;;  %v742_v50 = vpack.c.bf16 %v713_v41, %v712_v34 }
  0xea   : > { %v675_v46 = vpop.f32.mrf.mxu0 }
  0xeb   : > { %728 = vst [vmem:[#allocation2 + $0x68] sm:$0xff] %v711_v44  ;;  %v716_v47 = vmax.f32 %v684_v45, 0.0  ;;  %v676_v48 = vadd.f32 %v4200_v17, %v675_v46  ;;  %v741_v49 = vpack.c.bf16 %v711_v44, %v710_v38 }
  0xec   : > { %v3469_v51 = vpop.f32.mrf.mxu0 }
  0xed   : > { %733 = vst [vmem:[#allocation2 + $0x10] sm:$0xff] %v716_v47  ;;  %v714_v52 = vmax.f32 %v676_v48, 0.0  ;;  %v687_v53 = vadd.f32 %v3469_v51, %v4200_v17  ;;  %3494 = vmatprep.mubr.bf16.mxu1 %v741_v49 }
  0xee   : > { %v678_v54 = vpop.f32.mrf.mxu0  ;;  %3495 = vmatmul.mubr.bf16.vlgmr.msra.gmra.mxu1 %v742_v50 }
  0xef   : > { %731 = vst [vmem:[#allocation2 + $0x40] sm:$0xff] %v714_v52  ;;  %v717_v55 = vmax.f32 %v687_v53, 0.0  ;;  %v679_v56 = vadd.f32 %v4200_v17, %v678_v54 }
  0xf0   : > { %v3472_v57 = vpop.f32.mrf.mxu0 }
  0xf1   : > { %734 = vst [vmem:[#allocation2 + $0x38] sm:$0xff] %v717_v55  ;;  %v715_v58 = vmax.f32 %v679_v56, 0.0  ;;  %v700_v59 = vadd.f32 %v3472_v57, %v4200_v17  ;;  %v744_v0 = vpack.c.bf16 %v717_v55, %v716_v47 }
  0xf2   : > { %v691_v60 = vpop.f32.mrf.mxu0 }
  0xf3   : > { %732 = vst [vmem:[#allocation2 + $0x20] sm:$0xff] %v715_v58  ;;  %v743_v61 = vpack.c.bf16 %v715_v58, %v714_v52  ;;  %v720_v62 = vmax.f32 %v700_v59, 0.0  ;;  %v692_v63 = vadd.f32 %v4200_v17, %v691_v60 }
  0xf4   : > { %v3473_v1 = vpop.f32.mrf.mxu0 }
  0xf5   : > { %737 = vst [vmem:[#allocation2 + $0x78] sm:$0xff] %v720_v62  ;;  %v718_v2 = vmax.f32 %v692_v63, 0.0  ;;  %v703_v3 = vadd.f32 %v3473_v1, %v4200_v17  ;;  %3498 = vmatprep.mubr.bf16.mxu1 %v743_v61 }
  0xf6   : > { %v694_v4 = vpop.f32.mrf.mxu0  ;;  %3499 = vmatmul.mubr.bf16.gmra.mxu1 %v744_v0 }
  0xf7   : > { %735 = vst [vmem:[#allocation2 + $0x60] sm:$0xff] %v718_v2  ;;  %v721_v5 = vmax.f32 %v703_v3, 0.0  ;;  %v695_v6 = vadd.f32 %v4200_v17, %v694_v4 }
  0xf9   : > { %738 = vst [vmem:[#allocation2 + $0x28] sm:$0xff] %v721_v5  ;;  %v719_v7 = vmax.f32 %v695_v6, 0.0  ;;  %v746_v9 = vpack.c.bf16 %v721_v5, %v720_v62 }
  0xfb   : > { %736 = vst [vmem:[#allocation2 + $0x70] sm:$0xff] %v719_v7  ;;  %v745_v8 = vpack.c.bf16 %v719_v7, %v718_v2 }
  0xfd   : > { %3502 = vmatprep.mubr.bf16.mxu1 %v745_v8 }
  0xfe   : > { %3503 = vmatmul.mubr.bf16.gmra.mxu1 %v746_v9 }
 0x1a6   : > { %v3492_v10 = vpop.f32.mrf.mxu0 }
 0x1a7   : > { %v861_v14 = vadd.f32 %v3492_v10, %v3049_v11 }
 0x1a8   : > { %v852_v12 = vpop.f32.mrf.mxu0 }
 0x1a9   : > { %v853_v18 = vadd.f32 %v3049_v11, %v852_v12 }
 0x1aa   : > { %v3493_v13 = vpop.f32.mrf.mxu0 }
 0x1ab   : > { %v864_v15 = vadd.f32 %v3493_v13, %v3049_v11 }
 0x1ac   : > { %v855_v16 = vpop.f32.mrf.mxu0 }
 0x1ad   : > { %v3265_v19 = vpack.c.bf16 %v864_v15, %v861_v14  ;;  %v856_v17 = vadd.f32 %v3049_v11, %v855_v16 }
 0x1ae   : > { %v3496_v20 = vpop.f32.mrf.mxu1 }
 0x1af   : > { %3337 = vst [vmem:[#allocation3 + $0x8] sm:$0xff] %v3265_v19   ;;  %v3260_v21 = vpack.c.bf16 %v856_v17, %v853_v18  ;;  %v877_v24 = vadd.f32 %v3496_v20, %v3049_v11 }
 0x1b0   : > { %v868_v22 = vpop.f32.mrf.mxu1 }
 0x1b1   : > { %3261 = vst [vmem:[#allocation3] sm:$0xff] %v3260_v21   ;;  %v869_v27 = vadd.f32 %v3049_v11, %v868_v22 }
 0x1b2   : > { %v3497_v23 = vpop.f32.mrf.mxu1 }
 0x1b3   : > { %v880_v25 = vadd.f32 %v3497_v23, %v3049_v11 }
 0x1b4   : > { %v871_v26 = vpop.f32.mrf.mxu1 }
 0x1b5   : > { %v3275_v28 = vpack.c.bf16 %v880_v25, %v877_v24  ;;  %v872_v29 = vadd.f32 %v3049_v11, %v871_v26 }
 0x1b6   : > { %v3500_v30 = vpop.f32.mrf.mxu1 }
 0x1b7   : > { %3339 = vst [vmem:[#allocation3 + $0x18] sm:$0xff] %v3275_v28   ;;  %v3270_v31 = vpack.c.bf16 %v872_v29, %v869_v27  ;;  %v893_v34 = vadd.f32 %v3500_v30, %v3049_v11 }
 0x1b8   : > { %v884_v32 = vpop.f32.mrf.mxu1 }
 0x1b9   : > { %3338 = vst [vmem:[#allocation3 + $0x10] sm:$0xff] %v3270_v31   ;;  %v885_v37 = vadd.f32 %v3049_v11, %v884_v32 }
 0x1ba   : > { %v3501_v33 = vpop.f32.mrf.mxu1 }
 0x1bb   : > { %v896_v35 = vadd.f32 %v3501_v33, %v3049_v11 }
 0x1bc   : > { %v887_v36 = vpop.f32.mrf.mxu1 }
 0x1bd   : > { %v3285_v38 = vpack.c.bf16 %v896_v35, %v893_v34  ;;  %v888_v39 = vadd.f32 %v3049_v11, %v887_v36 }
 0x1be   : > { %v3504_v40 = vpop.f32.mrf.mxu1 }
 0x1bf   : > { %3341 = vst [vmem:[#allocation3 + $0x28] sm:$0xff] %v3285_v38   ;;  %v3280_v41 = vpack.c.bf16 %v888_v39, %v885_v37  ;;  %v909_v44 = vadd.f32 %v3504_v40, %v3049_v11 }
 0x1c0   : > { %v900_v42 = vpop.f32.mrf.mxu1 }
 0x1c1   : > { %3340 = vst [vmem:[#allocation3 + $0x20] sm:$0xff] %v3280_v41   ;;  %v901_v47 = vadd.f32 %v3049_v11, %v900_v42 }
 0x1c2   : > { %v3505_v43 = vpop.f32.mrf.mxu1 }
 0x1c3   : > { %v912_v45 = vadd.f32 %v3505_v43, %v3049_v11 }
 0x1c4   : > { %v903_v46 = vpop.f32.mrf.mxu1 }
 0x1c5   : > { %v3295_v48 = vpack.c.bf16 %v912_v45, %v909_v44  ;;  %v904_v49 = vadd.f32 %v3049_v11, %v903_v46 }
 0x1c7   : > { %3343 = vst [vmem:[#allocation3 + $0x38] sm:$0xff] %v3295_v48   ;;  %v3290_v50 = vpack.c.bf16 %v904_v49, %v901_v47 }
 0x1c9   : > { %3342 = vst [vmem:[#allocation3 + $0x30] sm:$0xff] %v3290_v50  }
 0x1ca PF: > { %p3074_p5 = scmp.le.s32.totalorder %s4031_s29, 0 }
 0x1cc   : > { %1002 = sbr.rel (%p3074_p5) target bundleno = 1564 (0x61c), region = 84 }
 0x1d1   : > { %s1003_s19 = sadd.s32 1, %s4031_s29  ;;  %p1017_p6 = scmp.lt.s32.totalorder %s4031_s29, 0  ;;  %v3764_v51 = vld [vmem:[%s4929_s1] sm:$0xff]   ;;  %v3772_v52 = vld [vmem:[%s4934_s6 + $0xac] ss:$12 sps:$4 sm:$0xff]   ;;  %v3766_v10 = vld [vmem:[%s4929_s1 + $0x10] sm:$0xff]  }
 0x1d2   : > { %p1004_p7 = scmp.lt.s32.totalorder %s1003_s19, 0  ;;  %s1005_s20 = ssub.s32 0, %s1003_s19  ;;  %3522 = vmatprep.mubr.bf16.mxu0 %v3764_v51  ;;  %1449 = vmatprep.subr.bf16.mxu1 %v3772_v52  ;;  %v3775_v53 = vld [vmem:[%s4934_s6 + $0xa8] ss:$12 sps:$4 sm:$0xff]   ;;  %v3779_v55 = vld [vmem:[%s4934_s6 + $0x90] ss:$12 sps:$4 sm:$0xff]  }
 0x1d3   : > { %s3075_s23 = smin.u32 %s1005_s20, %s1003_s19  ;;  %s1018_s24 = ssub.s32 0, %s4031_s29  ;;  %v3776_v54 = vld [vmem:[%s4934_s6 + $0x94] ss:$12 sps:$4 sm:$0xff]   ;;  %1450 = vmatpush1.bf16.msra.mxu1 %v3775_v53  ;;  %v3780_v56 = vld [vmem:[%s4934_s6 + $0x7c] ss:$12 sps:$4 sm:$0xff]   ;;  %v4041_v27 = vmov 0  }
 0x1d4   : > { %s1007_s25 = sand.u32 1, %s3075_s23   ;;  %s3079_s26 = smin.u32 %s4031_s29, %s1018_s24  ;;  %1451 = vmatprep.subr.bf16.mxu1 %v3776_v54  ;;  %v3783_v61 = vld [vmem:[%s4934_s6 + $0x78] ss:$12 sps:$4 sm:$0xff]   ;;  %v3787_v63 = vld [vmem:[%s4934_s6 + $0x60] ss:$12 sps:$4 sm:$0xff]   ;;  %v3770_v19 = vld [vmem:[%s4929_s1 + $0x30] sm:$0xff]   ;;  %1481 = vmatprep.mubr.bf16.mxu1 %v4041_v27 }
 0x1d5   : > { %s1008_s27 = ssub.s32 0, %s1007_s25  ;;  %s1020_s28 = sand.u32 1, %s3079_s26   ;;  %v3784_v62 = vld [vmem:[%s4934_s6 + $0x64] ss:$12 sps:$4 sm:$0xff]   ;;  %v3788_v0 = vld [vmem:[%s4934_s6 + $0x4c] ss:$12 sps:$4 sm:$0xff]  }
 0x1d6   : > { %s4964_s27 = smov (!%p1004_p7, %s1008_s27), %s1007_s25  ;;  %s1021_s17 = ssub.s32 0, %s1020_s28  ;;  %v3791_v3 = vld [vmem:[%s4934_s6 + $0x48] ss:$12 sps:$4 sm:$0xff]   ;;  %v3795_v5 = vld [vmem:[%s4934_s6 + $0x30] ss:$12 sps:$4 sm:$0xff]   ;;  %v3768_v14 = vld [vmem:[%s4929_s1 + $0x20] sm:$0xff]  }
 0x1d7   : > { %p3077_p8 = scmp.lt.s32.totalorder %s4964_s27, 0  ;;  %s1014_s18 = sadd.s32 2, %s4964_s27  ;;  %1452 = vmatpush1.bf16.msra.mxu1 %v3779_v55  ;;  %v3792_v4 = vld [vmem:[%s4934_s6 + $0x34] ss:$12 sps:$4 sm:$0xff]   ;;  %v3774_v8 = vld [vmem:[%s4934_s6 + $0xb0] ss:$12 sps:$4 sm:$0xff]  }
 0x1d8   : > { %s4966_s17 = smov (!%p1017_p6, %s1021_s17), %s1020_s28  ;;  %1453 = vmatprep.subr.bf16.mxu1 %v3780_v56  ;;  %v3765_v9 = vld [vmem:[%s4929_s1 + $0x8] sm:$0xff]   ;;  %v3778_v11 = vld [vmem:[%s4934_s6 + $0x98] ss:$12 sps:$4 sm:$0xff]   ;;  %v3790_v16 = vld [vmem:[%s4934_s6 + $0x50] ss:$12 sps:$4 sm:$0xff]   ;;  %p3184_p10 = scmp.ge.s32.totalorder %s4031_s29, 3 }
 0x1d9   : > { %s4968_s18 = smov (!%p3077_p8, %s1014_s18), %s4964_s27  ;;  %p3081_p9 = scmp.lt.s32.totalorder %s4966_s17, 0  ;;  %v3782_v12 = vld [vmem:[%s4934_s6 + $0x80] ss:$12 sps:$4 sm:$0xff]   ;;  %v3767_v13 = vld [vmem:[%s4929_s1 + $0x18] sm:$0xff]   ;;  %v3786_v15 = vld [vmem:[%s4934_s6 + $0x68] ss:$12 sps:$4 sm:$0xff]  }
 0x1da   : > { %s1027_s21 = sadd.s32 2, %s4966_s17  ;;  %s3078_s19 = sshll.u32 %s4968_s18, 7  ;;  %v3769_v18 = vld [vmem:[%s4929_s1 + $0x28] sm:$0xff]   ;;  %v3794_v17 = vld [vmem:[%s4934_s6 + $0x38] ss:$12 sps:$4 sm:$0xff]  }
 0x1db   : > { %s4970_s21 = smov (!%p3081_p9, %s1027_s21), %s4966_s17  ;;  %s1031_s25 = sshra.s32 %s3078_s19, 3  ;;  %1454 = vmatpush1.bf16.msra.mxu1 %v3783_v61  ;;  %v3771_v20 = vld [vmem:[%s4929_s1 + $0x38] sm:$0xff]   ;;  %v3798_v22 = vld [vmem:[%s4934_s6 + $0x20] ss:$12 sps:$4 sm:$0xff]   ;;  %v3800_v24 = vld [vmem:[%s4934_s6 + $0x4] ss:$12 sps:$4 sm:$0xff]  }
 0x1dc   : > { %s3082_s2 = sshll.u32 %s4970_s21, 7  ;;  %s3083_s27 = sshll.u32 %s1031_s25, 2  ;;  %1455 = vmatprep.subr.bf16.mxu1 %v3784_v62  ;;  %v3796_v21 = vld [vmem:[%s4934_s6 + $0x1c] ss:$12 sps:$4 sm:$0xff]   ;;  %v3799_v23 = vld [vmem:[%s4934_s6 + $0x18] ss:$12 sps:$4 sm:$0xff]  }
 0x1dd   : > { %s4249_s17 = scalar_lea.vmem [#allocation3], %s3083_s27  ;;  %v3802_v25 = vld [vmem:[%s4934_s6 + $0x8] ss:$12 sps:$4 sm:$0xff]   ;;  %v3803_v26 = vld [vmem:[%s4934_s6] ss:$12 sps:$4 sm:$0xff]   ;;  %s2725_s25 = sshra.s32 (!%p3184_p10), %s3082_s2, 3 }
 0x1de   : > { %v3756_v57 = vld [vmem:[%s4249_s17 + $0x38] sm:$0xff]   ;;  %v3757_v58 = vld [vmem:[%s4249_s17 + $0x30] sm:$0xff]   ;;  %v3758_v59 = vld [vmem:[%s4249_s17 + $0x28] sm:$0xff]   ;;  %s3210_s27 = sshll.u32 (!%p3184_p10), %s2725_s25, 2 }
 0x1df   : > { %3506 = vmatprep.subr.bf16.mxu0 %v3756_v57  ;;  %v3759_v60 = vld [vmem:[%s4249_s17 + $0x20] sm:$0xff]   ;;  %v3760_v1 = vld [vmem:[%s4249_s17 + $0x18] sm:$0xff]   ;;  %v3761_v2 = vld [vmem:[%s4249_s17 + $0x10] sm:$0xff]   ;;  %1456 = vmatpush1.bf16.msra.mxu1 %v3787_v63  ;;  %s2728_s21 = scalar_lea.vmem (!%p3184_p10), [#allocation3], %s3210_s27 }
 0x1e0   : > { %3507 = vmatpush3.bf16.msra.mxu0 %v3756_v57  ;;  %1457 = vmatprep.subr.bf16.mxu1 %v3788_v0  ;;  %v3762_v6 = vld [vmem:[%s4249_s17 + $0x8] sm:$0xff]   ;;  %v3763_v7 = vld [vmem:[%s4249_s17] sm:$0xff]   ;;  %v3828_v29 = vld [vmem:[%s4935_s7 + $0xb0] ss:$12 sps:$4 sm:$0xff]  }
 0x1e1   : > { %3508 = vmatprep.subr.bf16.mxu0 %v3757_v58  ;;  %v3806_v28 = vld [vmem:[%s4935_s7 + $0xac] ss:$12 sps:$4 sm:$0xff]   ;;  %v3804_v35 = vld [vmem:[%s4935_s7 + $0xa8] ss:$12 sps:$4 sm:$0xff]   ;;  %v3807_v41 = vld [vmem:[%s4935_s7 + $0x90] ss:$12 sps:$4 sm:$0xff]  }
 0x1e2   : > { %v3809_v38 = vld [vmem:[%s4935_s7 + $0x94] ss:$12 sps:$4 sm:$0xff]   ;;  %v3829_v39 = vld [vmem:[%s4935_s7 + $0x98] ss:$12 sps:$4 sm:$0xff]   ;;  %v3812_v43 = vld [vmem:[%s4935_s7 + $0x7c] ss:$12 sps:$4 sm:$0xff]  }
 0x1e3   : > { %1458 = vmatpush1.bf16.msra.mxu1 %v3791_v3  ;;  %v3830_v44 = vld [vmem:[%s4935_s7 + $0x80] ss:$12 sps:$4 sm:$0xff]   ;;  %v3810_v47 = vld [vmem:[%s4935_s7 + $0x78] ss:$12 sps:$4 sm:$0xff]   ;;  %v3831_v51 = vld [vmem:[%s4935_s7 + $0x68] ss:$12 sps:$4 sm:$0xff]  }
 0x1e4   : > { %3509 = vmatpush3.bf16.msra.mxu0 %v3757_v58  ;;  %1459 = vmatprep.subr.bf16.mxu1 %v3792_v4  ;;  %v3815_v50 = vld [vmem:[%s4935_s7 + $0x64] ss:$12 sps:$4 sm:$0xff]   ;;  %v3813_v53 = vld [vmem:[%s4935_s7 + $0x60] ss:$12 sps:$4 sm:$0xff]   ;;  %v3824_v3 = vld [vmem:[%s4935_s7 + $0x1c] ss:$12 sps:$4 sm:$0xff]  }
 0x1e5   : > { %3510 = vmatprep.subr.bf16.mxu0 %v3758_v59  ;;  %v3818_v55 = vld [vmem:[%s4935_s7 + $0x4c] ss:$12 sps:$4 sm:$0xff]   ;;  %v3832_v56 = vld [vmem:[%s4935_s7 + $0x50] ss:$12 sps:$4 sm:$0xff]   ;;  %v3821_v62 = vld [vmem:[%s4935_s7 + $0x34] ss:$12 sps:$4 sm:$0xff]  }
 0x1e6   : > { %v3833_v63 = vld [vmem:[%s4935_s7 + $0x38] ss:$12 sps:$4 sm:$0xff]   ;;  %v3834_v4 = vld [vmem:[%s4935_s7 + $0x20] ss:$12 sps:$4 sm:$0xff]  }
 0x1e7   : > { %1460 = vmatpush1.bf16.msra.mxu1 %v3795_v5 }
 0x1e8   : > { %3511 = vmatpush3.bf16.msra.mxu0 %v3758_v59  ;;  %1461 = vmatprep.subr.bf16.mxu1 %v3796_v21  ;;  %v3816_v59 = vld [vmem:[%s4935_s7 + $0x48] ss:$12 sps:$4 sm:$0xff]  }
 0x1e9   : > { %3512 = vmatprep.subr.bf16.mxu0 %v3759_v60  ;;  %v4439_v21 = vld [vmem:[#allocation2 + $0x8] sm:$0xff] }
 0x1eb   : > { %1462 = vmatpush1.bf16.msra.mxu1 %v3799_v23 }
 0x1ec   : > { %3513 = vmatpush3.bf16.msra.mxu0 %v3759_v60  ;;  %1463 = vmatprep.subr.bf16.mxu1 %v3800_v24  ;;  %v4446_v24 = vld [vmem:[#allocation2 + $0x40] sm:$0xff] }
 0x1ed   : > { %3514 = vmatprep.subr.bf16.mxu0 %v3760_v1 }
 0x1ef   : > { %1464 = vmatpush1.bf16.msra.mxu1 %v3803_v26 }
 0x1f0   : > { %3515 = vmatpush3.bf16.msra.mxu0 %v3760_v1  ;;  %3570 = vmatprep.subr.bf16.mxu1 %v3828_v29  ;;  %v3819_v1 = vld [vmem:[%s4935_s7 + $0x30] ss:$12 sps:$4 sm:$0xff]  }
 0x1f1   : > { %3516 = vmatprep.subr.bf16.mxu0 %v3761_v2 }
 0x1f4   : > { %3517 = vmatpush3.bf16.msra.mxu0 %v3761_v2 }
 0x1f5   : > { %3518 = vmatprep.subr.bf16.mxu0 %v3762_v6 }
 0x1f8   : > { %3519 = vmatpush3.bf16.msra.mxu0 %v3762_v6 }
 0x1f9   : > { %3520 = vmatprep.subr.bf16.mxu0 %v3763_v7 }
 0x1fc   : > { %3521 = vmatpush3.bf16.msra.mxu0 %v3763_v7  ;;  %v3822_v7 = vld [vmem:[%s4935_s7 + $0x18] ss:$12 sps:$4 sm:$0xff]  }
 0x1fd   : > { %3538 = vmatprep.subr.bf16.mxu0 %v3774_v8 }
 0x1ff   : > { %3523 = vmatmul.mubr.bf16.vlgmr.msra.gmra.mxu0 %v3765_v9  ;;  %v3827_v9 = vld [vmem:[%s4935_s7 + $0x4] ss:$12 sps:$4 sm:$0xff]  }
 0x200   : > { %3526 = vmatprep.mubr.bf16.mxu0 %v3766_v10  ;;  %3539 = vmatpush3.bf16.msra.mxu0 %v3774_v8  ;;  %v3835_v10 = vld [vmem:[%s4935_s7 + $0x8] ss:$12 sps:$4 sm:$0xff]  }
 0x201   : > { %3540 = vmatprep.subr.bf16.mxu0 %v3778_v11 }
 0x204   : > { %3541 = vmatpush3.bf16.msra.mxu0 %v3778_v11  ;;  %v3825_v11 = vld [vmem:[%s4935_s7] ss:$12 sps:$4 sm:$0xff]  }
 0x205   : > { %3542 = vmatprep.subr.bf16.mxu0 %v3782_v12 }
 0x207   : > { %3527 = vmatmul.mubr.bf16.gmra.mxu0 %v3767_v13  ;;  %v4417_v13 = vld [vmem:[#allocation2] sm:$0xff] }
 0x208   : > { %3530 = vmatprep.mubr.bf16.mxu0 %v3768_v14  ;;  %3543 = vmatpush3.bf16.msra.mxu0 %v3782_v12  ;;  %v4415_v12 = vld [vmem:[#allocation2 + $0x30] sm:$0xff] }
 0x209   : > { %3544 = vmatprep.subr.bf16.mxu0 %v3786_v15  ;;  %v1659_v14 = vpack.c.bf16 %v4417_v13, %v4415_v12 }
 0x20c   : > { %3545 = vmatpush3.bf16.msra.mxu0 %v3786_v15  ;;  %v4423_v15 = vld [vmem:[#allocation2 + $0x58] sm:$0xff] }
 0x20d   : > { %3546 = vmatprep.subr.bf16.mxu0 %v3790_v16 }
 0x20f   : > { %3531 = vmatmul.mubr.bf16.gmra.mxu0 %v3769_v18 }
 0x210   : > { %3534 = vmatprep.mubr.bf16.mxu0 %v3770_v19  ;;  %3547 = vmatpush3.bf16.msra.mxu0 %v3790_v16  ;;  %v4425_v16 = vld [vmem:[#allocation2 + $0x18] sm:$0xff]  ;;  %v4431_v19 = vld [vmem:[#allocation2 + $0x50] sm:$0xff] }
 0x211   : > { %3548 = vmatprep.subr.bf16.mxu0 %v3794_v17  ;;  %v1660_v18 = vpack.c.bf16 %v4425_v16, %v4423_v15 }
 0x214   : > { %3549 = vmatpush3.bf16.msra.mxu0 %v3794_v17  ;;  %v4433_v17 = vld [vmem:[#allocation2 + $0x68] sm:$0xff] }
 0x215   : > { %3550 = vmatprep.subr.bf16.mxu0 %v3798_v22 }
 0x217   : > { %3535 = vmatmul.mubr.bf16.gmra.mxu0 %v3771_v20  ;;  %v1661_v20 = vpack.c.bf16 %v4433_v17, %v4431_v19 }
 0x218   : > { %3551 = vmatpush3.bf16.msra.mxu0 %v3798_v22  ;;  %v4441_v22 = vld [vmem:[#allocation2 + $0x48] sm:$0xff] }
 0x219   : > { %3552 = vmatprep.subr.bf16.mxu0 %v3802_v25  ;;  %v1662_v23 = vpack.c.bf16 %v4441_v22, %v4439_v21 }
 0x21c   : > { %3553 = vmatpush3.bf16.msra.mxu0 %v3802_v25  ;;  %v4448_v25 = vld [vmem:[#allocation2 + $0x20] sm:$0xff] }
 0x21d   : > { %1827 = vmatprep.subr.bf16.mxu0 %v3806_v28  ;;  %4949 = vst [vmem:[#allocation4_spill] sm:$0xff] %v4448_v25  ;;  %v1663_v26 = vpack.c.bf16 %v4448_v25, %v4446_v24  ;;  %v4453_v28 = vld [vmem:[#allocation2 + $0x10] sm:$0xff] }
 0x21e   : > { %4950 = vst [vmem:[#allocation5_spill] sm:$0xff] %v4453_v28 }
 0x2bf   : > { %v3524_v30 = vpop.f32.mrf.mxu0 }
 0x2c1   : > { %v1201_v31 = vpop.f32.mrf.mxu0 }
 0x2c3   : > { %v3525_v32 = vpop.f32.mrf.mxu0 }
 0x2c4   : > { %v1282_v36 = vpack.c.bf16 %v3525_v32, %v3524_v30  ;;  %v1278_v32 = vld [vmem:[#allocation2 + $0x70] sm:$0xff] }
 0x2c5   : > { %v1204_v33 = vpop.f32.mrf.mxu0 }
 0x2c6   : > { %v1281_v34 = vpack.c.bf16 %v1204_v33, %v1201_v31  ;;  %v1277_v31 = vld [vmem:[#allocation2 + $0x60] sm:$0xff] }
 0x2c7   : > { %v3528_v37 = vpop.f32.mrf.mxu0  ;;  %v1665_v33 = vpack.c.bf16 %v1278_v32, %v1277_v31 }
 0x2c8   : > { %1482 = vmatmul.mubr.bf16.vlgmr.msra.gmra.mxu1 %v1281_v34  ;;  %3554 = vmatprep.mubr.bf16.mxu0 %v1281_v34  ;;  %v1279_v34 = vld [vmem:[#allocation2 + $0x78] sm:$0xff] }
 0x2c9   : > { %v1217_v40 = vpop.f32.mrf.mxu0  ;;  %3555 = vmatmul.mubr.bf16.vlgmr.msra.gmra.mxu0 %v1282_v36  ;;  %1491 = vmatprep.mubr.bf16.mxu1 %v4041_v27 }
 0x2ca   : > { %1828 = vmatpush1.bf16.msra.mxu0 %v3804_v35  ;;  %3571 = vmatpush3.bf16.msra.mxu1 %v3828_v29  ;;  %v1276_v29 = vld [vmem:[#allocation2 + $0x38] sm:$0xff]  ;;  %v1280_v35 = vld [vmem:[#allocation2 + $0x28] sm:$0xff] }
 0x2cb   : > { %v3529_v42 = vpop.f32.mrf.mxu0  ;;  %1829 = vmatprep.subr.bf16.mxu0 %v3809_v38  ;;  %3572 = vmatprep.subr.bf16.mxu1 %v3829_v39  ;;  %v1664_v30 = vpack.c.bf16 %v1276_v29, %v4453_v28 }
 0x2cc   : > { %v1284_v48 = vpack.c.bf16 %v3529_v42, %v3528_v37 }
 0x2cd   : > { %v1220_v45 = vpop.f32.mrf.mxu0 }
 0x2ce   : > { %v1283_v46 = vpack.c.bf16 %v1220_v45, %v1217_v40  ;;  %1830 = vmatpush1.bf16.msra.mxu0 %v3807_v41  ;;  %3573 = vmatpush3.bf16.msra.mxu1 %v3829_v39 }
 0x2cf   : > { %v3532_v49 = vpop.f32.mrf.mxu0  ;;  %1831 = vmatprep.subr.bf16.mxu0 %v3812_v43  ;;  %3574 = vmatprep.subr.bf16.mxu1 %v3830_v44 }
 0x2d0   : > { %1492 = vmatmul.mubr.bf16.gmra.mxu1 %v1282_v36  ;;  %3558 = vmatprep.mubr.bf16.mxu0 %v1283_v46  ;;  %v1666_v36 = vpack.c.bf16 %v1280_v35, %v1279_v34 }
 0x2d1   : > { %v1233_v52 = vpop.f32.mrf.mxu0  ;;  %3559 = vmatmul.mubr.bf16.gmra.mxu0 %v1284_v48  ;;  %1501 = vmatprep.mubr.bf16.mxu1 %v4041_v27 }
 0x2d2   : > { %1832 = vmatpush1.bf16.msra.mxu0 %v3810_v47  ;;  %3575 = vmatpush3.bf16.msra.mxu1 %v3830_v44 }
 0x2d3   : > { %v3533_v54 = vpop.f32.mrf.mxu0  ;;  %1833 = vmatprep.subr.bf16.mxu0 %v3815_v50  ;;  %3576 = vmatprep.subr.bf16.mxu1 %v3831_v51 }
 0x2d4   : > { %v1286_v60 = vpack.c.bf16 %v3533_v54, %v3532_v49 }
 0x2d5   : > { %v1236_v57 = vpop.f32.mrf.mxu0 }
 0x2d6   : > { %v1285_v58 = vpack.c.bf16 %v1236_v57, %v1233_v52  ;;  %1834 = vmatpush1.bf16.msra.mxu0 %v3813_v53  ;;  %3577 = vmatpush3.bf16.msra.mxu1 %v3831_v51 }
 0x2d7   : > { %v3536_v61 = vpop.f32.mrf.mxu0  ;;  %1835 = vmatprep.subr.bf16.mxu0 %v3818_v55  ;;  %3578 = vmatprep.subr.bf16.mxu1 %v3832_v56 }
 0x2d8   : > { %1502 = vmatmul.mubr.bf16.gmra.mxu1 %v1283_v46  ;;  %3562 = vmatprep.mubr.bf16.mxu0 %v1285_v58 }
 0x2d9   : > { %v1249_v0 = vpop.f32.mrf.mxu0  ;;  %3563 = vmatmul.mubr.bf16.gmra.mxu0 %v1286_v60  ;;  %1511 = vmatprep.mubr.bf16.mxu1 %v4041_v27 }
 0x2da   : > { %1836 = vmatpush1.bf16.msra.mxu0 %v3816_v59  ;;  %3579 = vmatpush3.bf16.msra.mxu1 %v3832_v56 }
 0x2db   : > { %v3537_v2 = vpop.f32.mrf.mxu0  ;;  %1837 = vmatprep.subr.bf16.mxu0 %v3821_v62  ;;  %3580 = vmatprep.subr.bf16.mxu1 %v3833_v63 }
 0x2dc   : > { %v1288_v8 = vpack.c.bf16 %v3537_v2, %v3536_v61 }
 0x2dd   : > { %v1252_v5 = vpop.f32.mrf.mxu0 }
 0x2de   : > { %v1287_v6 = vpack.c.bf16 %v1252_v5, %v1249_v0  ;;  %1838 = vmatpush1.bf16.msra.mxu0 %v3819_v1  ;;  %3581 = vmatpush3.bf16.msra.mxu1 %v3833_v63  ;;  %v4505_v1 = vld [vmem:[%s4938_s10] ss:$0 sm:$0xff] }
 0x2df   : > { %1839 = vmatprep.subr.bf16.mxu0 %v3824_v3  ;;  %3582 = vmatprep.subr.bf16.mxu1 %v3834_v4 }
 0x2e0   : > { %1512 = vmatmul.mubr.bf16.gmra.mxu1 %v1284_v48  ;;  %3566 = vmatprep.mubr.bf16.mxu0 %v1287_v6 }
 0x2e1   : > { %3567 = vmatmul.mubr.bf16.gmra.mxu0 %v1288_v8  ;;  %1521 = vmatprep.mubr.bf16.mxu1 %v4041_v27 }
 0x2e2   : > { %1840 = vmatpush1.bf16.msra.mxu0 %v3822_v7  ;;  %1859 = vmatprep.mubr.bf16.mxu0 %v4041_v27 }
 0x2e3   : > { %1841 = vmatprep.subr.bf16.mxu0 %v3827_v9  ;;  %3583 = vmatpush3.bf16.msra.mxu1 %v3834_v4 }
 0x2e4   : > { %3584 = vmatprep.subr.bf16.mxu1 %v3835_v10 }
 0x2e6   : > { %1842 = vmatpush1.bf16.msra.mxu0 %v3825_v11 }
 0x2e7   : > { %3585 = vmatpush3.bf16.msra.mxu1 %v3835_v10 }
 0x2e8   : > { %1522 = vmatmul.mubr.bf16.gmra.mxu1 %v1285_v58 }
 0x2e9   : > { %1860 = vmatmul.mubr.bf16.vlgmr.msra.gmra.mxu0 %v1659_v14  ;;  %1531 = vmatprep.mubr.bf16.mxu1 %v4041_v27 }
 0x2ea   : > { %1869 = vmatprep.mubr.bf16.mxu0 %v4041_v27 }
 0x2f0   : > { %1532 = vmatmul.mubr.bf16.gmra.mxu1 %v1286_v60 }
 0x2f1   : > { %1870 = vmatmul.mubr.bf16.gmra.mxu0 %v1660_v18  ;;  %1541 = vmatprep.mubr.bf16.mxu1 %v4041_v27 }
 0x2f2   : > { %1879 = vmatprep.mubr.bf16.mxu0 %v4041_v27 }
 0x2f8   : > { %1542 = vmatmul.mubr.bf16.gmra.mxu1 %v1287_v6 }
 0x2f9   : > { %1880 = vmatmul.mubr.bf16.gmra.mxu0 %v1661_v20  ;;  %1551 = vmatprep.mubr.bf16.mxu1 %v4041_v27 }
 0x2fa   : > { %1889 = vmatprep.mubr.bf16.mxu0 %v4041_v27 }
 0x300   : > { %1552 = vmatmul.mubr.bf16.gmra.mxu1 %v1288_v8  ;;  %v4519_v8 = vld [vmem:[%s4936_s8] ss:$0 sm:$0xff] }
 0x301   : > { %1890 = vmatmul.mubr.bf16.gmra.mxu0 %v1662_v23  ;;  %3586 = vmatprep.mubr.bf16.mxu1 %v1659_v14  ;;  %v4526_v14 = vld [vmem:[%s4937_s9] ss:$0 sm:$0xff] }
 0x302   : > { %1899 = vmatprep.mubr.bf16.mxu0 %v4041_v27 }
 0x308   : > { %3587 = vmatmul.mubr.bf16.vlgmr.msra.gmra.mxu1 %v1660_v18 }
 0x309   : > { %1900 = vmatmul.mubr.bf16.gmra.mxu0 %v1663_v26  ;;  %3590 = vmatprep.mubr.bf16.mxu1 %v1661_v20 }
 0x30a   : > { %1909 = vmatprep.mubr.bf16.mxu0 %v4041_v27 }
 0x310   : > { %3591 = vmatmul.mubr.bf16.gmra.mxu1 %v1662_v23 }
 0x311   : > { %1910 = vmatmul.mubr.bf16.gmra.mxu0 %v1664_v30  ;;  %3594 = vmatprep.mubr.bf16.mxu1 %v1663_v26 }
 0x312   : > { %1919 = vmatprep.mubr.bf16.mxu0 %v4041_v27 }
 0x318   : > { %3595 = vmatmul.mubr.bf16.gmra.mxu1 %v1664_v30 }
 0x319   : > { %1920 = vmatmul.mubr.bf16.gmra.mxu0 %v1665_v33  ;;  %3598 = vmatprep.mubr.bf16.mxu1 %v1665_v33 }
 0x31a   : > { %1929 = vmatprep.mubr.bf16.mxu0 %v4041_v27 }
 0x320   : > { %3599 = vmatmul.mubr.bf16.gmra.mxu1 %v1666_v36 }
 0x321   : > { %1930 = vmatmul.mubr.bf16.gmra.mxu0 %v1666_v36 }
 0x388   : > { %v1483_v37 = vpop.f32.mrf.mxu1 }
 0x389   : > { %v4458_v38 = vpop.f32.mrf.mxu0 }
 0x38a   : > { %v1485_v39 = vpop.f32.mrf.mxu1 }
 0x38b   : > { %v4460_v40 = vpop.f32.mrf.mxu0 }
 0x38c   : > { %v1487_v41 = vpop.f32.mrf.mxu1 }
 0x38d   : > { %v4462_v42 = vpop.f32.mrf.mxu0 }
 0x38e   : > { %v1489_v43 = vpop.f32.mrf.mxu1 }
 0x38f   : > { %v4464_v44 = vpop.f32.mrf.mxu0 }
 0x390   : > { %v1493_v45 = vpop.f32.mrf.mxu1 }
 0x391   : > { %v4466_v46 = vpop.f32.mrf.mxu0 }
 0x392   : > { %v1495_v27 = vpop.f32.mrf.mxu1 }
 0x393   : > { %v4468_v47 = vpop.f32.mrf.mxu0 }
 0x394   : > { %v1497_v48 = vpop.f32.mrf.mxu1 }
 0x395   : > { %v4470_v49 = vpop.f32.mrf.mxu0 }
 0x396   : > { %v4472_v50 = vpop.f32.mrf.mxu1 }
 0x397   : > { %v4474_v51 = vpop.f32.mrf.mxu0 }
 0x398   : > { %v4476_v52 = vpop.f32.mrf.mxu1 }
 0x399   : > { %v4478_v53 = vpop.f32.mrf.mxu0 }
 0x39a   : > { %v4480_v54 = vpop.f32.mrf.mxu1 }
 0x39b   : > { %v4482_v55 = vpop.f32.mrf.mxu0 }
 0x39c   : > { %v4484_v56 = vpop.f32.mrf.mxu1 }
 0x39d   : > { %v4486_v57 = vpop.f32.mrf.mxu0 }
 0x39e   : > { %v4488_v58 = vpop.f32.mrf.mxu1 }
 0x39f   : > { %v4490_v59 = vpop.f32.mrf.mxu0 }
 0x3a0   : > { %v4492_v60 = vpop.f32.mrf.mxu1 }
 0x3a1   : > { %v4494_v61 = vpop.f32.mrf.mxu0 }
 0x3a2   : > { %4951 = vst [vmem:[#allocation6_spill] sm:$0xff] %v4494_v61  ;;  %v4496_v62 = vpop.f32.mrf.mxu1 }
 0x3a3   : > { %v4498_v63 = vpop.f32.mrf.mxu0 }
 0x3a4   : > { %v4500_v0 = vpop.f32.mrf.mxu1 }
 0x3a5   : > { %v3569_v2 = vpop.f32.mrf.mxu0 }
 0x3a6   : > { %v4508_v3 = vadd.f32 %v3569_v2, %v4505_v1  ;;  %v4510_v4 = vpop.f32.mrf.mxu1 }
 0x3a7   : > { %v4512_v5 = vpop.f32.mrf.mxu0 }
 0x3a8   : > { %4952 = vst [vmem:[#allocation7_spill] sm:$0xff] %v4508_v3  ;;  %4953 = vst [vmem:[#allocation8_spill] sm:$0xff] %v4512_v5  ;;  %v4514_v6 = vpop.f32.mrf.mxu1 }
 0x3a9   : > { %v1861_v7 = vpop.f32.mrf.mxu0 }
 0x3aa   : > { %v2037_v9 = vadd.f32 %v1861_v7, %v1483_v37  ;;  %v4521_v10 = vpop.f32.mrf.mxu1 }
 0x3ab   : > { %v1863_v11 = vpop.f32.mrf.mxu0 }
 0x3ac   : > { %v2060_v18 = vadd.f32 %v4519_v8, %v2037_v9  ;;  %v2172_v20 = vadd.f32 %v1863_v11, %v1485_v39  ;;  %v4529_v23 = vpop.f32.mrf.mxu1 }
 0x3ad   : > { %v1865_v26 = vpop.f32.mrf.mxu0 }
 0x3ae   : > { %v3149_v29 = vmul.f32 -1.442695, %v2060_v18  ;;  %v2195_v30 = vadd.f32 %v4526_v14, %v2172_v20  ;;  %v2038_v31 = vadd.f32 %v1865_v26, %v1487_v41  ;;  %v4532_v32 = vpop.f32.mrf.mxu1 }
 0x3af   : > { %v1867_v33 = vpop.f32.mrf.mxu0 }
 0x3b0   : > { %3836 = vpow2.f32 %v3149_v29  ;;  %v3166_v34 = vmul.f32 -1.442695, %v2195_v30  ;;  %v2061_v35 = vadd.f32 %v4519_v8, %v2038_v31  ;;  %v2173_v36 = vadd.f32 %v1867_v33, %v1489_v43  ;;  %v4535_v37 = vpop.f32.mrf.mxu1 }
 0x3b1   : > { %v1871_v2 = vpop.f32.mrf.mxu0 }
 0x3b2   : > { %3838 = vpow2.f32 %v3166_v34  ;;  %v3150_v39 = vmul.f32 -1.442695, %v2061_v35  ;;  %v2196_v7 = vadd.f32 %v4526_v14, %v2173_v36  ;;  %v2039_v9 = vadd.f32 %v1871_v2, %v1493_v45  ;;  %v4538_v11 = vpop.f32.mrf.mxu1 }
 0x3b3   : > { %v1873_v18 = vpop.f32.mrf.mxu0 }
 0x3b4   : > { %3840 = vpow2.f32 %v3150_v39  ;;  %v3167_v41 = vmul.f32 -1.442695, %v2196_v7  ;;  %v2062_v20 = vadd.f32 %v4519_v8, %v2039_v9  ;;  %v2174_v26 = vadd.f32 %v1873_v18, %v1495_v27  ;;  %v4541_v29 = vpop.f32.mrf.mxu1 }
 0x3b5   : > { %v1875_v30 = vpop.f32.mrf.mxu0 }
 0x3b6   : > { %v3151_v43 = vmul.f32 -1.442695, %v2062_v20  ;;  %v2197_v31 = vadd.f32 %v4526_v14, %v2174_v26  ;;  %v2040_v33 = vadd.f32 %v1875_v30, %v1497_v48  ;;  %v4544_v34 = vpop.f32.mrf.mxu1  ;;  %3842 = vpow2.f32 %v3167_v41 }
 0x3b7   : > { %v1877_v35 = vpop.f32.mrf.mxu0 }
 0x3b8   : > { %3844 = vpow2.f32 %v3151_v43  ;;  %v3168_v45 = vmul.f32 -1.442695, %v2197_v31  ;;  %v2063_v36 = vadd.f32 %v4519_v8, %v2040_v33  ;;  %v2175_v2 = vadd.f32 %v1877_v35, %v4472_v50  ;;  %v4548_v39 = vpop.f32.mrf.mxu1 }
 0x3b9   : > { %v1881_v27 = vpop.f32.mrf.mxu0 }
 0x3ba   : > { %v3152_v7 = vmul.f32 -1.442695, %v2063_v36  ;;  %v2198_v9 = vadd.f32 %v4526_v14, %v2175_v2  ;;  %v2041_v18 = vadd.f32 %v1881_v27, %v4476_v52  ;;  %v4552_v20 = vpop.f32.mrf.mxu1  ;;  %3846 = vpow2.f32 %v3168_v45 }
 0x3bb   : > { %v1883_v48 = vpop.f32.mrf.mxu0 }
 0x3bc   : > { %3848 = vpow2.f32 %v3152_v7  ;;  %v3169_v41 = vmul.f32 -1.442695, %v2198_v9  ;;  %v2064_v26 = vadd.f32 %v4519_v8, %v2041_v18  ;;  %v2176_v30 = vadd.f32 %v1883_v48, %v4480_v54  ;;  %v4556_v43 = vpop.f32.mrf.mxu1 }
 0x3bd   : > { %v3837_v50 = vpop.eup %3836  ;;  %v1885_v31 = vpop.f32.mrf.mxu0 }
 0x3be   : > { %v2124_v33 = vadd.f32 1.0, %v3837_v50  ;;  %v3153_v35 = vmul.f32 -1.442695, %v2064_v26  ;;  %v2199_v36 = vadd.f32 %v4526_v14, %v2176_v30  ;;  %v4559_v2 = vpop.f32.mrf.mxu1  ;;  %3850 = vpow2.f32 %v3169_v41 }
 0x3bf   : > { %v3839_v52 = vpop.eup %3838  ;;  %v2042_v45 = vadd.f32 %v1885_v31, %v4484_v56  ;;  %v1887_v27 = vpop.f32.mrf.mxu0 }
 0x3c0   : > { %3852 = vrcp.f32 %v2124_v33  ;;  %v2259_v7 = vadd.f32 1.0, %v3839_v52  ;;  %v3170_v9 = vmul.f32 -1.442695, %v2199_v36  ;;  %v2177_v54 = vadd.f32 %v1887_v27, %v4488_v58  ;;  %v4563_v18 = vpop.f32.mrf.mxu1 }
 0x3c1   : > { %v3841_v48 = vpop.eup %3840  ;;  %3854 = vpow2.f32 %v3153_v35  ;;  %v2065_v26 = vadd.f32 %v4519_v8, %v2042_v45  ;;  %v1891_v50 = vpop.f32.mrf.mxu0 }
 0x3c2   : > { %v2125_v30 = vadd.f32 1.0, %v3841_v48  ;;  %v2200_v3 = vadd.f32 %v4526_v14, %v2177_v54  ;;  %v2043_v41 = vadd.f32 %v1891_v50, %v4492_v60  ;;  %v4568_v28 = vpop.f32.mrf.mxu1  ;;  %3856 = vpow2.f32 %v3170_v9 }
 0x3c3   : > { %v3154_v56 = vmul.f32 -1.442695, %v2065_v26  ;;  %v1893_v31 = vpop.f32.mrf.mxu0  ;;  %v3843_v33 = vpop.eup %3842  ;;  %3858 = vrcp.f32 %v2259_v7 }
 0x3c4   : > { %v3171_v58 = vmul.f32 -1.442695, %v2200_v3  ;;  %v2066_v36 = vadd.f32 %v4519_v8, %v2043_v41  ;;  %v4571_v52 = vpop.f32.mrf.mxu1  ;;  %v2178_v45 = vadd.f32 %v1893_v31, %v4496_v62  ;;  %v2260_v26 = vadd.f32 1.0, %v3843_v33 }
 0x3c5   : > { %v3845_v35 = vpop.eup %3844  ;;  %3860 = vpow2.f32 %v3154_v56  ;;  %v1895_v27 = vpop.f32.mrf.mxu0 }
 0x3c6   : > { %3862 = vrcp.f32 %v2125_v30  ;;  %v2126_v54 = vadd.f32 1.0, %v3845_v35  ;;  %v3155_v60 = vmul.f32 -1.442695, %v2066_v36  ;;  %v2044_v48 = vadd.f32 %v1895_v27, %v4500_v0  ;;  %v4575_v9 = vpop.f32.mrf.mxu1  ;;  %v4583_v30 = vld [vmem:[%s4939_s11] ss:$0 sm:$0xff] }
 0x3c7   : > { %3864 = vpow2.f32 %v3171_v58  ;;  %v2201_v3 = vadd.f32 %v4526_v14, %v2178_v45  ;;  %v1897_v7 = vpop.f32.mrf.mxu0  ;;  %v3847_v50 = vpop.eup %3846 }
 0x3c8   : > { %3866 = vrcp.f32 %v2126_v54  ;;  %v2067_v41 = vadd.f32 %v4519_v8, %v2044_v48  ;;  %v2179_v56 = vadd.f32 %v1897_v7, %v4510_v4  ;;  %v3588_v62 = vpop.f32.mrf.mxu1  ;;  %v2261_v27 = vadd.f32 1.0, %v3847_v50 }
 0x3c9   : > { %v3849_v0 = vpop.eup %3848  ;;  %3868 = vpow2.f32 %v3155_v60  ;;  %v1901_v31 = vpop.f32.mrf.mxu0  ;;  %v3172_v58 = vmul.f32 -1.442695, %v2201_v3 }
 0x3ca   : > { %v2127_v33 = vadd.f32 1.0, %v3849_v0  ;;  %v3156_v36 = vmul.f32 -1.442695, %v2067_v41  ;;  %v2202_v35 = vadd.f32 %v4526_v14, %v2179_v56  ;;  %v1974_v45 = vpop.f32.mrf.mxu1  ;;  %3870 = vrcp.f32 %v2260_v26 }
 0x3cb   : > { %v2045_v54 = vadd.f32 %v1901_v31, %v4514_v6  ;;  %v1903_v4 = vpop.f32.mrf.mxu0  ;;  %v2337_v48 = vadd.f32 %v4583_v30, %v1974_v45  ;;  %v3851_v7 = vpop.eup %3850 }
 0x3cc   : > { %3872 = vrcp.f32 %v2127_v33  ;;  %v3173_v61 = vmul.f32 -1.442695, %v2202_v35  ;;  %v2180_v5 = vadd.f32 %v1903_v4, %v4521_v10  ;;  %v3589_v0 = vpop.f32.mrf.mxu1  ;;  %v2262_v31 = vadd.f32 1.0, %v3851_v7 }
 0x3cd   : > { %v3853_v60 = vpop.eup %3852  ;;  %3874 = vpow2.f32 %v3156_v36  ;;  %v2068_v3 = vadd.f32 %v4519_v8, %v2045_v54  ;;  %v1905_v41 = vpop.f32.mrf.mxu0  ;;  %v2314_v10 = vadd.f32 %v4505_v1, %v4460_v40 }
 0x3ce   : > { %v3855_v56 = vpop.eup %3854  ;;  %3876 = vpow2.f32 %v3172_v58  ;;  %v2203_v26 = vadd.f32 %v4526_v14, %v2180_v5  ;;  %v2353_v50 = vmul.f32 %v3853_v60, %v2337_v48  ;;  %v2046_v6 = vadd.f32 %v1905_v41, %v4529_v23  ;;  %v1977_v4 = vpop.f32.mrf.mxu1 }
 0x3cf   : > { %3878 = vrcp.f32 %v2261_v27  ;;  %v2128_v45 = vadd.f32 1.0, %v3855_v56  ;;  %v3157_v33 = vmul.f32 -1.442695, %v2068_v3  ;;  %v1907_v35 = vpop.f32.mrf.mxu0  ;;  %v3857_v25 = vpop.eup %3856  ;;  %v2339_v27 = vadd.f32 %v3588_v62, %v4583_v30 }
 0x3d0   : > { %3880 = vpow2.f32 %v3173_v61  ;;  %v4594_v36 = vpop.eup %3858  ;;  %v2263_v54 = vadd.f32 1.0, %v3857_v25  ;;  %v3174_v58 = vmul.f32 -1.442695, %v2203_v26  ;;  %v2069_v5 = vadd.f32 %v4519_v8, %v2046_v6 }
 0x3d1   : > { %3882 = vrcp.f32 %v2128_v45  ;;  %v1911_v48 = vpop.f32.mrf.mxu0  ;;  %v2369_v7 = vadd.f32 %v2353_v50, %v2314_v10  ;;  %v2181_v40 = vadd.f32 %v1907_v35, %v4532_v32  ;;  %v2338_v25 = vadd.f32 %v4583_v30, %v1977_v4 }
 0x3d2   : > { %v3861_v23 = vpop.eup %3860  ;;  %3884 = vpow2.f32 %v3157_v33  ;;  %v3158_v56 = vmul.f32 -1.442695, %v2069_v5  ;;  %v2047_v6 = vadd.f32 %v1911_v48, %v4535_v37  ;;  %v4601_v33 = vpop.f32.mrf.mxu1  ;;  %v2316_v50 = vadd.f32 %v4458_v38, %v4505_v1 }
 0x3d3   : > { %v3863_v60 = vpop.eup %3862  ;;  %3886 = vrcp.f32 %v2262_v31  ;;  %v2129_v3 = vadd.f32 1.0, %v3861_v23  ;;  %v1913_v61 = vpop.f32.mrf.mxu0  ;;  %v2340_v32 = vadd.f32 %v3589_v0, %v4583_v30  ;;  %v2317_v35 = vadd.f32 %v4462_v42, %v4505_v1 }
 0x3d4   : > { %v3865_v41 = vpop.eup %3864  ;;  %3888 = vrcp.f32 %v2263_v54  ;;  %v2204_v54 = vadd.f32 %v4526_v14, %v2181_v40  ;;  %v2354_v48 = vmul.f32 %v3863_v60, %v2338_v25  ;;  %v2315_v38 = vadd.f32 %v4505_v1, %v4464_v44 }
 0x3d5   : > { %v3867_v26 = vpop.eup %3866  ;;  %3890 = vpow2.f32 %v3174_v58  ;;  %v1915_v45 = vpop.f32.mrf.mxu0  ;;  %v2264_v5 = vadd.f32 1.0, %v3865_v41  ;;  %v2070_v0 = vadd.f32 %v4519_v8, %v2047_v6  ;;  %v4617_v40 = vadd.f32 %v4466_v46, %v4505_v1 }
 0x3d6   : > { %v3869_v62 = vpop.eup %3868  ;;  %v2355_v31 = vmul.f32 %v3867_v26, %v2339_v27  ;;  %3892 = vtanh.f32 %v2369_v7  ;;  %v2048_v42 = vadd.f32 %v1915_v45, %v4541_v29  ;;  %v1990_v7 = vpop.f32.mrf.mxu1  ;;  %v4621_v41 = vadd.f32 %v4505_v1, %v4468_v47 }
 0x3d7   : > { %3894 = vrcp.f32 %v2129_v3  ;;  %v2130_v10 = vadd.f32 1.0, %v3869_v62  ;;  %v1917_v58 = vpop.f32.mrf.mxu0  ;;  %v4609_v37 = vpop.eup %3870  ;;  %v3175_v25 = vmul.f32 -1.442695, %v2204_v54  ;;  %v2182_v26 = vadd.f32 %v1913_v61, %v4538_v11 }
 0x3d8   : > { %v2371_v4 = vadd.f32 %v2355_v31, %v2316_v50  ;;  %3896 = vpow2.f32 %v3158_v56  ;;  %v4629_v46 = vadd.f32 %v4470_v49, %v4505_v1  ;;  %v2370_v47 = vadd.f32 %v2354_v48, %v2315_v38  ;;  %v3593_v61 = vpop.f32.mrf.mxu1 }
 0x3d9   : > { %v3873_v23 = vpop.eup %3872  ;;  %3898 = vrcp.f32 %v2130_v10  ;;  %v1921_v27 = vpop.f32.mrf.mxu0  ;;  %v4633_v31 = vadd.f32 %v4505_v1, %v4474_v51  ;;  %v2071_v11 = vadd.f32 %v4519_v8, %v2048_v42  ;;  %v2433_v54 = vmul.f32 %v4594_v36, %v4415_v12 }
 0x3da   : > { %v3875_v3 = vpop.eup %3874  ;;  %3900 = vtanh.f32 %v2371_v4  ;;  %v2356_v60 = vmul.f32 %v3873_v23, %v2340_v32  ;;  %v2049_v29 = vadd.f32 %v1921_v27, %v4548_v39  ;;  %v3159_v32 = vmul.f32 -1.442695, %v2070_v0 }
 0x3db   : > { %v3877_v56 = vpop.eup %3876  ;;  %v2131_v44 = vadd.f32 1.0, %v3875_v3  ;;  %v1923_v6 = vpop.f32.mrf.mxu0  ;;  %3902 = vrcp.f32 %v2264_v5  ;;  %v2401_v4 = vsub.f32 1.0, %v4594_v36  ;;  %v2205_v51 = vadd.f32 %v4526_v14, %v2182_v26 }
 0x3dc   : > { %v4625_v45 = vpop.eup %3878  ;;  %v2372_v62 = vadd.f32 %v2356_v60, %v2317_v35  ;;  %v2265_v49 = vadd.f32 1.0, %v3877_v56  ;;  %v2341_v35 = vadd.f32 %v4583_v30, %v1990_v7  ;;  %v2072_v48 = vadd.f32 %v4519_v8, %v2049_v29  ;;  %v1993_v60 = vpop.f32.mrf.mxu1 }
 0x3dd   : > { %v3881_v50 = vpop.eup %3880  ;;  %3904 = vrcp.f32 %v2131_v44  ;;  %v1925_v39 = vpop.f32.mrf.mxu0  ;;  %v2183_v12 = vadd.f32 %v1917_v58, %v4544_v34  ;;  %v3160_v7 = vmul.f32 -1.442695, %v2071_v11  ;;  %v2184_v3 = vadd.f32 %v1923_v6, %v4552_v20 }
 0x3de   : > { %v3883_v10 = vpop.eup %3882  ;;  %3906 = vtanh.f32 %v2372_v62  ;;  %v2266_v0 = vadd.f32 1.0, %v3881_v50  ;;  %v2050_v36 = vadd.f32 %v1925_v39, %v4556_v43  ;;  %v2343_v34 = vadd.f32 %v4601_v33, %v4583_v30  ;;  %v4660_v6 = vpop.f32.mrf.mxu1 }
 0x3df   : > { %v3885_v5 = vpop.eup %3884  ;;  %3908 = vpow2.f32 %v3175_v25  ;;  %v1927_v23 = vpop.f32.mrf.mxu0  ;;  %v4653_v25 = vmul.f32 %v4609_v37, %v4417_v13  ;;  %v2357_v58 = vmul.f32 %v3883_v10, %v2341_v35  ;;  %v2435_v29 = vmul.f32 %v4625_v45, %v4423_v15 }
 0x3e0   : > { %v4642_v38 = vpop.eup %3886  ;;  %v2132_v42 = vadd.f32 1.0, %v3885_v5  ;;  %3910 = vtanh.f32 %v2370_v47  ;;  %v2403_v20 = vsub.f32 1.0, %v4625_v45  ;;  %v3161_v43 = vmul.f32 -1.442695, %v2072_v48 }
 0x3e1   : > { %v4645_v27 = vpop.eup %3888  ;;  %3912 = vpow2.f32 %v3159_v32  ;;  %v1931_v56 = vpop.f32.mrf.mxu0  ;;  %v2206_v13 = vadd.f32 %v4526_v14, %v2183_v12  ;;  %v2342_v50 = vadd.f32 %v4583_v30, %v1993_v60  ;;  %v3176_v33 = vmul.f32 -1.442695, %v2205_v51 }
 0x3e2   : > { %v4649_v44 = vpop.eup %3890  ;;  %3914 = vrcp.f32 %v2265_v49  ;;  %v2207_v11 = vadd.f32 %v4526_v14, %v2184_v3  ;;  %v2073_v15 = vadd.f32 %v4519_v8, %v2050_v36  ;;  %v2373_v35 = vadd.f32 %v2357_v58, %v4621_v41 }
 0x3e3   : > { %v3893_v26 = vpop.eup %3892  ;;  %3916 = vrcp.f32 %v2132_v42  ;;  %v1933_v39 = vpop.f32.mrf.mxu0  ;;  %v2051_v5 = vadd.f32 %v1931_v56, %v4563_v18  ;;  %v2404_v48 = vsub.f32 1.0, %v4642_v38  ;;  %v2344_v51 = vadd.f32 %v3593_v61, %v4583_v30 }
 0x3e4   : > { %v3895_v62 = vpop.eup %3894  ;;  %3918 = vrcp.f32 %v2266_v0  ;;  %v2417_v47 = vmul.f32 %v3893_v26, %v2401_v4  ;;  %v2006_v42 = vpop.f32.mrf.mxu1  ;;  %v3162_v18 = vmul.f32 -1.442695, %v2073_v15  ;;  %v2185_v36 = vadd.f32 %v1927_v23, %v4559_v2 }
 0x3e5   : > { %v3897_v32 = vpop.eup %3896  ;;  %3920 = vpow2.f32 %v3160_v7  ;;  %v3177_v7 = vmul.f32 -1.442695, %v2206_v13  ;;  %v1935_v60 = vpop.f32.mrf.mxu0  ;;  %v3178_v61 = vmul.f32 -1.442695, %v2207_v11  ;;  %v2074_v58 = vadd.f32 %v4519_v8, %v2051_v5 }
 0x3e6   : > { %v3899_v10 = vpop.eup %3898  ;;  %v4666_v45 = vadd.f32 %v2433_v54, %v2417_v47  ;;  %v2133_v49 = vadd.f32 1.0, %v3897_v32  ;;  %3922 = vpow2.f32 %v3161_v43  ;;  %v2358_v54 = vmul.f32 %v3895_v62, %v2342_v50 }
 0x3e7   : > { %v3901_v4 = vpop.eup %3900  ;;  %v2359_v0 = vmul.f32 %v3899_v10, %v2343_v34  ;;  %v2402_v43 = vsub.f32 1.0, %v4609_v37  ;;  %v2186_v37 = vadd.f32 %v1933_v39, %v4568_v28  ;;  %v3163_v11 = vmul.f32 -1.442695, %v2074_v58 }
 0x3e8   : > { %v2419_v12 = vmul.f32 %v3901_v4, %v2403_v20  ;;  %2465 = vst [vmem:[#allocation2 + $0x30] sm:$0xff] %v4666_v45  ;;  %3924 = vrcp.f32 %v2133_v49  ;;  %v4673_v3 = vpop.eup %3902  ;;  %v2436_v20 = vmul.f32 %v4642_v38, %v4425_v16  ;;  %v2374_v23 = vadd.f32 %v2358_v54, %v4633_v31 }
 0x3e9   : > { %3926 = vpow2.f32 %v3176_v33  ;;  %v2375_v41 = vadd.f32 %v2359_v0, %v4617_v40  ;;  %v4683_v40 = vpop.f32.mrf.mxu1  ;;  %v2208_v16 = vadd.f32 %v4526_v14, %v2185_v36  ;;  %v2267_v10 = vadd.f32 1.0, %v4649_v44  ;;  %v1937_v0 = vpop.f32.mrf.mxu0 }
 0x3ea   : > { %v3905_v56 = vpop.eup %3904  ;;  %v4677_v34 = vadd.f32 %v2435_v29, %v2419_v12  ;;  %3928 = vtanh.f32 %v2373_v35  ;;  %v2052_v29 = vadd.f32 %v1935_v60, %v4571_v52  ;;  %v2345_v52 = vadd.f32 %v4583_v30, %v2006_v42 }
 0x3eb   : > { %v3907_v26 = vpop.eup %3906  ;;  %3930 = vtanh.f32 %v2375_v41  ;;  %v2360_v62 = vmul.f32 %v3905_v56, %v2344_v51  ;;  %v2009_v49 = vpop.f32.mrf.mxu1  ;;  %v3179_v44 = vmul.f32 -1.442695, %v2208_v16  ;;  %v2323_v41 = vadd.f32 %v4505_v1, %v4490_v59 }
 0x3ec   : > { %v3909_v47 = vpop.eup %3908  ;;  %2467 = vst [vmem:[#allocation2 + $0x58] sm:$0xff] %v4677_v34  ;;  %v2420_v2 = vmul.f32 %v3907_v26, %v2404_v48  ;;  %3932 = vpow2.f32 %v3177_v7  ;;  %v2075_v39 = vadd.f32 %v4519_v8, %v2052_v29  ;;  %v2209_v48 = vadd.f32 %v4526_v14, %v2186_v37 }
 0x3ed   : > { %v3911_v13 = vpop.eup %3910  ;;  %3934 = vpow2.f32 %v3162_v18  ;;  %v2376_v50 = vadd.f32 %v2360_v62, %v4629_v46  ;;  %v2268_v46 = vadd.f32 1.0, %v3909_v47  ;;  %v2346_v51 = vadd.f32 %v4583_v30, %v2009_v49 }
 0x3ee   : > { %v3913_v38 = vpop.eup %3912  ;;  %v4691_v32 = vadd.f32 %v2436_v20, %v2420_v2  ;;  %v2418_v33 = vmul.f32 %v3911_v13, %v2402_v43  ;;  %3936 = vpow2.f32 %v3178_v61  ;;  %v2322_v7 = vadd.f32 %v4505_v1, %v4482_v55  ;;  %v4711_v2 = vpop.f32.mrf.mxu1 }
 0x3ef   : > { %v3915_v15 = vpop.eup %3914  ;;  %v2134_v31 = vadd.f32 1.0, %v3913_v38  ;;  %3938 = vtanh.f32 %v2376_v50  ;;  %v3164_v8 = vmul.f32 -1.442695, %v2075_v39  ;;  %v2187_v36 = vadd.f32 %v1937_v0, %v4575_v9 }
 0x3f0   : > { %v3917_v35 = vpop.eup %3916  ;;  %2468 = vst [vmem:[#allocation2 + $0x18] sm:$0xff] %v4691_v32  ;;  %v4697_v28 = vadd.f32 %v4653_v25, %v2418_v33  ;;  %3940 = vtanh.f32 %v2374_v23  ;;  %v2405_v56 = vsub.f32 1.0, %v4645_v27  ;;  %v3180_v61 = vmul.f32 -1.442695, %v2209_v48 }
 0x3f1   : > { %v3919_v5 = vpop.eup %3918  ;;  %3942 = vrcp.f32 %v2134_v31  ;;  %v2361_v12 = vmul.f32 %v3917_v35, %v2345_v52  ;;  %v2407_v20 = vsub.f32 1.0, %v3915_v15  ;;  %v2437_v62 = vmul.f32 %v4645_v27, %v4431_v19 }
 0x3f2   : > { %v3921_v4 = vpop.eup %3920  ;;  %2466 = vst [vmem:[#allocation2] sm:$0xff] %v4697_v28  ;;  %3944 = vpow2.f32 %v3163_v11  ;;  %v2439_v23 = vmul.f32 %v3915_v15, %v4439_v21  ;;  %v2210_v13 = vadd.f32 %v4526_v14, %v2187_v36  ;;  %v2408_v37 = vsub.f32 1.0, %v3919_v5  ;;  %v2022_v14 = vpop.f32.mrf.mxu1 }
 0x3f3   : > { %3946 = vrcp.f32 %v2267_v10  ;;  %v2135_v42 = vadd.f32 1.0, %v3921_v4  ;;  %v3923_v25 = vpop.eup %3922  ;;  %v2377_v55 = vadd.f32 %v2361_v12, %v2322_v7  ;;  %v2347_v38 = vadd.f32 %v4660_v6, %v4583_v30 }
 0x3f4   : > { %3948 = vrcp.f32 %v2268_v46  ;;  %v2136_v18 = vadd.f32 1.0, %v3923_v25  ;;  %v2406_v21 = vsub.f32 1.0, %v4673_v3  ;;  %v2440_v52 = vmul.f32 %v3919_v5, %v4441_v22  ;;  %v4735_v12 = vpop.f32.mrf.mxu1 }
 0x3f5   : > { %v3925_v54 = vpop.eup %3924  ;;  %3950 = vrcp.f32 %v2135_v42  ;;  %v3181_v49 = vmul.f32 -1.442695, %v2210_v13  ;;  %v2324_v46 = vadd.f32 %v4478_v53, %v4505_v1  ;;  %v2438_v39 = vmul.f32 %v4673_v3, %v4433_v17 }
 0x3f6   : > { %v3927_v60 = vpop.eup %3926  ;;  %3952 = vpow2.f32 %v3179_v44  ;;  %v2362_v58 = vmul.f32 %v3925_v54, %v2346_v51  ;;  %v2348_v22 = vadd.f32 %v4683_v40, %v4583_v30  ;;  %v2349_v3 = vadd.f32 %v4583_v30, %v2022_v14 }
 0x3f7   : > { %v3929_v26 = vpop.eup %3928  ;;  %3954 = vrcp.f32 %v2136_v18  ;;  %v2269_v27 = vadd.f32 1.0, %v3927_v60  ;;  %v2025_v18 = vpop.f32.mrf.mxu1  ;;  %v2326_v60 = vadd.f32 %v4505_v1, %v4498_v63 }
 0x3f8   : > { %v3931_v43 = vpop.eup %3930  ;;  %v2421_v47 = vmul.f32 %v3929_v26, %v2405_v56  ;;  %3956 = vpow2.f32 %v3164_v8  ;;  %v2378_v59 = vadd.f32 %v2362_v58, %v2323_v41  ;;  %v2325_v8 = vadd.f32 %v4486_v57, %v4505_v1 }
 0x3f9   : > { %v3933_v9 = vpop.eup %3932  ;;  %v2423_v29 = vmul.f32 %v3931_v43, %v2407_v20  ;;  %3958 = vpow2.f32 %v3180_v61 }
 0x3fa   : > { %v3935_v50 = vpop.eup %3934  ;;  %v4715_v16 = vadd.f32 %v2437_v62, %v2421_v47  ;;  %3960 = vtanh.f32 %v2377_v55  ;;  %v2270_v31 = vadd.f32 1.0, %v3933_v9  ;;  %v2350_v62 = vadd.f32 %v4583_v30, %v2025_v18  ;;  %v3997_v18 = vld [vmem:[#allocation2 + $0x60] sm:$0xff] }
 0x3fb   : > { %v3937_v19 = vpop.eup %3936  ;;  %v4719_v33 = vadd.f32 %v2439_v23, %v2423_v29  ;;  %v2137_v11 = vadd.f32 1.0, %v3935_v50  ;;  %3962 = vtanh.f32 %v2378_v59  ;;  %v4954_v29 = vld [vmem:[#allocation4_spill] sm:$0xff] }
 0x3fc   : > { %v3939_v10 = vpop.eup %3938  ;;  %2469 = vst [vmem:[#allocation2 + $0x50] sm:$0xff] %v4715_v16  ;;  %v2271_v25 = vadd.f32 1.0, %v3937_v19 }
 0x3fd   : > { %v3941_v15 = vpop.eup %3940  ;;  %2471 = vst [vmem:[#allocation2 + $0x8] sm:$0xff] %v4719_v33  ;;  %3964 = vrcp.f32 %v2137_v11  ;;  %v2424_v6 = vmul.f32 %v3939_v10, %v2408_v37  ;;  %v4955_v37 = vld [vmem:[#allocation8_spill] sm:$0xff] }
 0x3fe   : > { %v3943_v35 = vpop.eup %3942  ;;  %v2422_v4 = vmul.f32 %v3941_v15, %v2406_v21  ;;  %3966 = vrcp.f32 %v2269_v27  ;;  %v2351_v15 = vadd.f32 %v4711_v2, %v4583_v30  ;;  %v2352_v2 = vadd.f32 %v4735_v12, %v4583_v30 }
 0x3ff   : > { %v3945_v44 = vpop.eup %3944  ;;  %v4729_v48 = vadd.f32 %v2440_v52, %v2424_v6  ;;  %v2363_v0 = vmul.f32 %v3943_v35, %v2347_v38  ;;  %3968 = vrcp.f32 %v2270_v31  ;;  %v2327_v38 = vadd.f32 %v4505_v1, %v4955_v37  ;;  %v4956_v35 = vld [vmem:[#allocation6_spill] sm:$0xff] }
 0x400   : > { %v3947_v5 = vpop.eup %3946  ;;  %v4733_v51 = vadd.f32 %v2438_v39, %v2422_v4  ;;  %v2138_v42 = vadd.f32 1.0, %v3945_v44  ;;  %3970 = vpow2.f32 %v3181_v49  ;;  %v4957_v4 = vld [vmem:[#allocation5_spill] sm:$0xff] }
 0x401   : > { %v3949_v53 = vpop.eup %3948  ;;  %2472 = vst [vmem:[#allocation2 + $0x48] sm:$0xff] %v4729_v48  ;;  %v2379_v17 = vadd.f32 %v2363_v0, %v2324_v46  ;;  %v2409_v26 = vsub.f32 1.0, %v3947_v5  ;;  %v2441_v9 = vmul.f32 %v3947_v5, %v4446_v24  ;;  %v2328_v46 = vadd.f32 %v4956_v35, %v4505_v1 }
 0x402   : > { %v3951_v7 = vpop.eup %3950  ;;  %2470 = vst [vmem:[#allocation2 + $0x68] sm:$0xff] %v4733_v51  ;;  %3972 = vrcp.f32 %v2138_v42  ;;  %v2410_v47 = vsub.f32 1.0, %v3949_v53  ;;  %v2442_v13 = vmul.f32 %v3949_v53, %v4954_v29 }
 0x403   : > { %v3953_v40 = vpop.eup %3952  ;;  %3974 = vtanh.f32 %v2379_v17  ;;  %v2364_v54 = vmul.f32 %v3951_v7, %v2348_v22  ;;  %v3996_v7 = vld [vmem:[#allocation2 + $0x38] sm:$0xff] }
 0x404   : > { %v3955_v41 = vpop.eup %3954  ;;  %3976 = vrcp.f32 %v2271_v25  ;;  %v2272_v55 = vadd.f32 1.0, %v3953_v40 }
 0x405   : > { %v3957_v36 = vpop.eup %3956  ;;  %v2380_v56 = vadd.f32 %v2364_v54, %v2325_v8  ;;  %v2365_v61 = vmul.f32 %v3955_v41, %v2349_v3 }
 0x406   : > { %v2139_v58 = vadd.f32 1.0, %v3957_v36  ;;  %v3959_v20 = vpop.eup %3958 }
 0x407   : > { %3978 = vtanh.f32 %v2380_v56  ;;  %v2381_v43 = vadd.f32 %v2365_v61, %v2326_v60  ;;  %v3961_v57 = vpop.eup %3960  ;;  %v2273_v10 = vadd.f32 1.0, %v3959_v20 }
 0x408   : > { %3980 = vrcp.f32 %v2139_v58  ;;  %v3963_v59 = vpop.eup %3962  ;;  %v2425_v23 = vmul.f32 %v3961_v57, %v2409_v26  ;;  %v4958_v58 = vld [vmem:[#allocation7_spill] sm:$0xff] }
 0x409   : > { %3982 = vtanh.f32 %v2381_v43  ;;  %v2426_v50 = vmul.f32 %v3963_v59, %v2410_v47  ;;  %v3998_v43 = vld [vmem:[#allocation2 + $0x70] sm:$0xff] }
 0x40a   : > { %v3965_v63 = vpop.eup %3964  ;;  %3984 = vrcp.f32 %v2272_v55  ;;  %v4749_v19 = vadd.f32 %v2441_v9, %v2425_v23  ;;  %v3999_v23 = vld [vmem:[#allocation2 + $0x78] sm:$0xff] }
 0x40b   : > { %v2366_v27 = vmul.f32 %v3965_v63, %v2350_v62  ;;  %v3967_v11 = vpop.eup %3966  ;;  %v4751_v31 = vadd.f32 %v2442_v13, %v2426_v50 }
 0x40c   : > { %v3969_v21 = vpop.eup %3968  ;;  %2473 = vst [vmem:[#allocation2 + $0x40] sm:$0xff] %v4749_v19  ;;  %v2411_v6 = vsub.f32 1.0, %v3967_v11  ;;  %v2443_v44 = vmul.f32 %v3967_v11, %v4957_v4 }
 0x40d   : > { %v2382_v24 = vadd.f32 %v2366_v27, %v2327_v38  ;;  %v3971_v14 = vpop.eup %3970  ;;  %2474 = vst [vmem:[#allocation2 + $0x20] sm:$0xff] %v4751_v31  ;;  %v2412_v25 = vsub.f32 1.0, %v3969_v21  ;;  %v2444_v40 = vmul.f32 %v3996_v7, %v3969_v21  ;;  %v4000_v27 = vld [vmem:[#allocation2 + $0x28] sm:$0xff] }
 0x40e   : > { %v2274_v5 = vadd.f32 1.0, %v3971_v14 }
 0x40f   : > { %v3973_v52 = vpop.eup %3972  ;;  %3986 = vtanh.f32 %v2382_v24 }
 0x410   : > { %v3975_v49 = vpop.eup %3974  ;;  %3988 = vrcp.f32 %v2273_v10  ;;  %v2367_v39 = vmul.f32 %v3973_v52, %v2351_v15 }
 0x411   : > { %v2427_v0 = vmul.f32 %v3975_v49, %v2411_v6  ;;  %v3977_v22 = vpop.eup %3976 }
 0x412   : > { %v2383_v42 = vadd.f32 %v2367_v39, %v2328_v46  ;;  %v2413_v8 = vsub.f32 1.0, %v3977_v22  ;;  %v2445_v36 = vmul.f32 %v3997_v18, %v3977_v22 }
 0x413   : > { %v4760_v53 = vadd.f32 %v2443_v44, %v2427_v0 }
 0x414   : > { %v3979_v17 = vpop.eup %3978  ;;  %3990 = vtanh.f32 %v2383_v42 }
 0x415   : > { %v3981_v3 = vpop.eup %3980  ;;  %2475 = vst [vmem:[#allocation2 + $0x10] sm:$0xff] %v4760_v53  ;;  %v2428_v1 = vmul.f32 %v3979_v17, %v2412_v25  ;;  %3992 = vrcp.f32 %v2274_v5 }
 0x416   : > { %v3983_v54 = vpop.eup %3982  ;;  %v2368_v41 = vmul.f32 %v3981_v3, %v2352_v2 }
 0x417   : > { %v4765_v60 = vadd.f32 %v2444_v40, %v2428_v1  ;;  %v2429_v56 = vmul.f32 %v3983_v54, %v2413_v8  ;;  %v3985_v61 = vpop.eup %3984 }
 0x418   : > { %v2384_v26 = vadd.f32 %v2368_v41, %v4958_v58  ;;  %v2414_v12 = vsub.f32 1.0, %v3985_v61  ;;  %v2446_v62 = vmul.f32 %v3998_v43, %v3985_v61 }
 0x419   : > { %2476 = vst [vmem:[#allocation2 + $0x38] sm:$0xff] %v4765_v60  ;;  %v4769_v30 = vadd.f32 %v2445_v36, %v2429_v56 }
 0x41a   : > { %3994 = vtanh.f32 %v2384_v26 }
 0x41b   : > { %2477 = vst [vmem:[#allocation2 + $0x60] sm:$0xff] %v4769_v30 }
 0x41c   : > { %v3987_v20 = vpop.eup %3986 }
 0x41d   : > { %v3989_v55 = vpop.eup %3988  ;;  %v2430_v57 = vmul.f32 %v3987_v20, %v2414_v12 }
 0x41e   : > { %v2415_v59 = vsub.f32 1.0, %v3989_v55  ;;  %v2447_v63 = vmul.f32 %v3999_v23, %v3989_v55 }
 0x41f   : > { %v4772_v47 = vadd.f32 %v2446_v62, %v2430_v57 }
 0x421   : > { %v3991_v9 = vpop.eup %3990  ;;  %2478 = vst [vmem:[#allocation2 + $0x70] sm:$0xff] %v4772_v47 }
 0x422   : > { %v2431_v29 = vmul.f32 %v3991_v9, %v2415_v59  ;;  %v3993_v13 = vpop.eup %3992 }
 0x423   : > { %v2416_v37 = vsub.f32 1.0, %v3993_v13  ;;  %v2448_v11 = vmul.f32 %v4000_v27, %v3993_v13 }
 0x424   : > { %v4775_v50 = vadd.f32 %v2447_v63, %v2431_v29 }
 0x426   : > { %2479 = vst [vmem:[#allocation2 + $0x78] sm:$0xff] %v4775_v50 }
 0x427   : > { %v3995_v38 = vpop.eup %3994 }
 0x428   : > { %v2432_v10 = vmul.f32 %v3995_v38, %v2416_v37  ;;  %2484 = sbr.rel (%p3184_p10) target bundleno = 1314 (0x522), region = 88 }
 0x42a   : > { %v4778_v21 = vadd.f32 %v2448_v11, %v2432_v10 }
 0x42c   : > { %2480 = vst [vmem:[#allocation2 + $0x28] sm:$0xff] %v4778_v21 }
 0x42d   : > { %v4001_v24 = vld [vmem:[%s4932_s4 + $0x38] sm:$0xff]   ;;  %v4002_v14 = vld [vmem:[%s4932_s4 + $0x30] sm:$0xff]   ;;  %v2485_v15 = vpack.c.bf16 %v4697_v28, %v4666_v45  ;;  %v2489_v52 = vpack.c.bf16 %v4751_v31, %v4749_v19  ;;  %v4003_v6 = vld [vmem:[%s4932_s4 + $0x28] sm:$0xff]   ;;  %v2486_v44 = vpack.c.bf16 %v4691_v32, %v4677_v34  ;;  %v2490_v0 = vpack.c.bf16 %v4765_v60, %v4760_v53 }
 0x42e   : > { %3602 = vmatprep.subr.bf16.mxu0 %v4001_v24  ;;  %3682 = vmatprep.subr.bf16.mxu1 %v4001_v24  ;;  %v4004_v49 = vld [vmem:[%s4932_s4 + $0x20] sm:$0xff]   ;;  %v4005_v35 = vld [vmem:[%s4932_s4 + $0x18] sm:$0xff]   ;;  %v4006_v46 = vld [vmem:[%s4932_s4 + $0x10] sm:$0xff]   ;;  %v2487_v22 = vpack.c.bf16 %v4733_v51, %v4715_v16  ;;  %v2491_v5 = vpack.c.bf16 %v4772_v47, %v4769_v30  ;;  %v2488_v42 = vpack.c.bf16 %v4729_v48, %v4719_v33 }
 0x42f   : > { %3603 = vmatpush3.bf16.msra.mxu0 %v4001_v24  ;;  %3690 = vmatpush3.bf16.msra.mxu1 %v4001_v24  ;;  %v4007_v39 = vld [vmem:[%s4932_s4 + $0x8] sm:$0xff]   ;;  %v4008_v4 = vld [vmem:[%s4932_s4] sm:$0xff]   ;;  %v2492_v25 = vpack.c.bf16 %v4778_v21, %v4775_v50 }
 0x430   : > { %3604 = vmatprep.subr.bf16.mxu0 %v4002_v14  ;;  %3683 = vmatprep.subr.bf16.mxu1 %v4002_v14  ;;  %v3185_v3 = vld [vmem:[%s4933_s5] ss:$0 sm:$0xff] }
 0x431   : > { %3618 = vmatprep.mubr.bf16.mxu0 %v2485_v15  ;;  %3626 = vmatprep.mubr.bf16.mxu1 %v2489_v52 }
 0x433   : > { %3605 = vmatpush3.bf16.msra.mxu0 %v4002_v14  ;;  %3691 = vmatpush3.bf16.msra.mxu1 %v4002_v14 }
 0x434   : > { %3606 = vmatprep.subr.bf16.mxu0 %v4003_v6  ;;  %3684 = vmatprep.subr.bf16.mxu1 %v4003_v6 }
 0x437   : > { %3607 = vmatpush3.bf16.msra.mxu0 %v4003_v6  ;;  %3692 = vmatpush3.bf16.msra.mxu1 %v4003_v6 }
 0x438   : > { %3608 = vmatprep.subr.bf16.mxu0 %v4004_v49  ;;  %3685 = vmatprep.subr.bf16.mxu1 %v4004_v49 }
 0x43b   : > { %3609 = vmatpush3.bf16.msra.mxu0 %v4004_v49  ;;  %3693 = vmatpush3.bf16.msra.mxu1 %v4004_v49 }
 0x43c   : > { %3610 = vmatprep.subr.bf16.mxu0 %v4005_v35  ;;  %3686 = vmatprep.subr.bf16.mxu1 %v4005_v35 }
 0x43f   : > { %3611 = vmatpush3.bf16.msra.mxu0 %v4005_v35  ;;  %3694 = vmatpush3.bf16.msra.mxu1 %v4005_v35 }
 0x440   : > { %3612 = vmatprep.subr.bf16.mxu0 %v4006_v46  ;;  %3687 = vmatprep.subr.bf16.mxu1 %v4006_v46 }
 0x443   : > { %3613 = vmatpush3.bf16.msra.mxu0 %v4006_v46  ;;  %3695 = vmatpush3.bf16.msra.mxu1 %v4006_v46 }
 0x444   : > { %3614 = vmatprep.subr.bf16.mxu0 %v4007_v39  ;;  %3688 = vmatprep.subr.bf16.mxu1 %v4007_v39 }
 0x447   : > { %3615 = vmatpush3.bf16.msra.mxu0 %v4007_v39  ;;  %3696 = vmatpush3.bf16.msra.mxu1 %v4007_v39 }
 0x448   : > { %3616 = vmatprep.subr.bf16.mxu0 %v4008_v4  ;;  %3689 = vmatprep.subr.bf16.mxu1 %v4008_v4 }
 0x44b   : > { %3617 = vmatpush3.bf16.msra.mxu0 %v4008_v4  ;;  %3697 = vmatpush3.bf16.msra.mxu1 %v4008_v4 }
 0x44e   : > { %3619 = vmatmul.mubr.bf16.vlgmr.msra.gmra.mxu0 %v2486_v44  ;;  %3627 = vmatmul.mubr.bf16.vlgmr.msra.gmra.mxu1 %v2490_v0 }
 0x44f   : > { %3622 = vmatprep.mubr.bf16.mxu0 %v2487_v22  ;;  %3630 = vmatprep.mubr.bf16.mxu1 %v2491_v5 }
 0x456   : > { %3623 = vmatmul.mubr.bf16.gmra.mxu0 %v2488_v42  ;;  %3631 = vmatmul.mubr.bf16.gmra.mxu1 %v2492_v25 }
 0x50e   : > { %v3620_v17 = vpop.f32.mrf.mxu0  ;;  %v3628_v2 = vpop.f32.mrf.mxu1 }
 0x50f   : > { %v2607_v54 = vadd.f32 %v3620_v17, %v3185_v3  ;;  %v2639_v41 = vadd.f32 %v3628_v2, %v3185_v3 }
 0x510   : > { %v2598_v7 = vpop.f32.mrf.mxu0  ;;  %v2630_v40 = vpop.f32.mrf.mxu1 }
 0x511   : > { %v2599_v56 = vadd.f32 %v3185_v3, %v2598_v7  ;;  %v2631_v61 = vadd.f32 %v3185_v3, %v2630_v40 }
 0x512   : > { %v3621_v1 = vpop.f32.mrf.mxu0  ;;  %v3629_v8 = vpop.f32.mrf.mxu1 }
 0x513   : > { %v2610_v18 = vadd.f32 %v3621_v1, %v3185_v3  ;;  %v2642_v36 = vadd.f32 %v3629_v8, %v3185_v3 }
 0x514   : > { %v2601_v58 = vpop.f32.mrf.mxu0  ;;  %v2633_v26 = vpop.f32.mrf.mxu1 }
 0x515   : > { %v3305_v12 = vpack.c.bf16 %v2610_v18, %v2607_v54  ;;  %v3325_v20 = vpack.c.bf16 %v2642_v36, %v2639_v41  ;;  %v2602_v55 = vadd.f32 %v3185_v3, %v2601_v58  ;;  %v2634_v43 = vadd.f32 %v3185_v3, %v2633_v26 }
 0x516   : > { %v3624_v62 = vpop.f32.mrf.mxu0  ;;  %v3632_v57 = vpop.f32.mrf.mxu1 }
 0x517   : > { %3344 = vst [vmem:[%s2728_s21 + $0x8] sm:$0xff] %v3305_v12   ;;  %3348 = vst [vmem:[%s2728_s21 + $0x28] sm:$0xff] %v3325_v20   ;;  %v3300_v59 = vpack.c.bf16 %v2602_v55, %v2599_v56  ;;  %v3320_v9 = vpack.c.bf16 %v2634_v43, %v2631_v61  ;;  %v2623_v37 = vadd.f32 %v3624_v62, %v3185_v3 }
 0x518   : > { %v2614_v23 = vpop.f32.mrf.mxu0  ;;  %v2646_v63 = vpop.f32.mrf.mxu1  ;;  %v2655_v38 = vadd.f32 %v3632_v57, %v3185_v3 }
 0x519   : > { %3301 = vst [vmem:[%s2728_s21] sm:$0xff] %v3300_v59   ;;  %3347 = vst [vmem:[%s2728_s21 + $0x20] sm:$0xff] %v3320_v9   ;;  %v2615_v10 = vadd.f32 %v3185_v3, %v2614_v23  ;;  %v2647_v24 = vadd.f32 %v3185_v3, %v2646_v63 }
 0x51a   : > { %v3625_v29 = vpop.f32.mrf.mxu0  ;;  %v3633_v13 = vpop.f32.mrf.mxu1 }
 0x51b   : > { %v2626_v27 = vadd.f32 %v3625_v29, %v3185_v3  ;;  %v2658_v11 = vadd.f32 %v3633_v13, %v3185_v3 }
 0x51c   : > { %v2617_v14 = vpop.f32.mrf.mxu0  ;;  %v2649_v15 = vpop.f32.mrf.mxu1 }
 0x51d   : > { %v3315_v52 = vpack.c.bf16 %v2626_v27, %v2623_v37  ;;  %v3335_v6 = vpack.c.bf16 %v2658_v11, %v2655_v38  ;;  %v2618_v49 = vadd.f32 %v3185_v3, %v2617_v14  ;;  %v2650_v35 = vadd.f32 %v3185_v3, %v2649_v15 }
 0x51f   : > { %3346 = vst [vmem:[%s2728_s21 + $0x18] sm:$0xff] %v3315_v52   ;;  %3350 = vst [vmem:[%s2728_s21 + $0x38] sm:$0xff] %v3335_v6   ;;  %v3310_v46 = vpack.c.bf16 %v2618_v49, %v2615_v10  ;;  %v3330_v39 = vpack.c.bf16 %v2650_v35, %v2647_v24 }
 0x521   : > { %3345 = vst [vmem:[%s2728_s21 + $0x10] sm:$0xff] %v3310_v46   ;;  %3349 = vst [vmem:[%s2728_s21 + $0x30] sm:$0xff] %v3330_v39  }
 0x522 PF: > { %p3211_p11 = scmp.ne.s32.totalorder %s4031_s29, 3 }
 0x524   : > { %2748 = sbr.rel (%p3211_p11) target bundleno = 1564 (0x61c), region = 92 }
 0x529   : > { %v4009_v4 = vld [vmem:[%s4940_s12 + $0x38] sm:$0xff]   ;;  %v4010_v44 = vld [vmem:[%s4940_s12 + $0x30] sm:$0xff]   ;;  %v2749_v0 = vpack.c.bf16 %v4697_v28, %v4666_v45  ;;  %v2753_v22 = vpack.c.bf16 %v4751_v31, %v4749_v19  ;;  %v4011_v5 = vld [vmem:[%s4940_s12 + $0x28] sm:$0xff]   ;;  %v2750_v25 = vpack.c.bf16 %v4691_v32, %v4677_v34  ;;  %v2754_v17 = vpack.c.bf16 %v4765_v60, %v4760_v53 }
 0x52a   : > { %3634 = vmatprep.subr.bf16.mxu0 %v4009_v4  ;;  %3698 = vmatprep.subr.bf16.mxu1 %v4009_v4  ;;  %v4012_v45 = vld [vmem:[%s4940_s12 + $0x20] sm:$0xff]   ;;  %v4013_v28 = vld [vmem:[%s4940_s12 + $0x18] sm:$0xff]   ;;  %v4014_v19 = vld [vmem:[%s4940_s12 + $0x10] sm:$0xff]   ;;  %v2751_v2 = vpack.c.bf16 %v4733_v51, %v4715_v16  ;;  %v2755_v3 = vpack.c.bf16 %v4772_v47, %v4769_v30  ;;  %v2752_v7 = vpack.c.bf16 %v4729_v48, %v4719_v33 }
 0x52b   : > { %3635 = vmatpush3.bf16.msra.mxu0 %v4009_v4  ;;  %3706 = vmatpush3.bf16.msra.mxu1 %v4009_v4  ;;  %v4015_v31 = vld [vmem:[%s4940_s12 + $0x8] sm:$0xff]   ;;  %v4016_v42 = vld [vmem:[%s4940_s12] sm:$0xff]   ;;  %v2756_v34 = vpack.c.bf16 %v4778_v21, %v4775_v50 }
 0x52c   : > { %3636 = vmatprep.subr.bf16.mxu0 %v4010_v44  ;;  %3699 = vmatprep.subr.bf16.mxu1 %v4010_v44  ;;  %v3212_v32 = vld [vmem:[%s4941_s13] ss:$0 sm:$0xff] }
 0x52d   : > { %3650 = vmatprep.mubr.bf16.mxu0 %v2749_v0  ;;  %3658 = vmatprep.mubr.bf16.mxu1 %v2753_v22 }
 0x52f   : > { %3637 = vmatpush3.bf16.msra.mxu0 %v4010_v44  ;;  %3707 = vmatpush3.bf16.msra.mxu1 %v4010_v44 }
 0x530   : > { %3638 = vmatprep.subr.bf16.mxu0 %v4011_v5  ;;  %3700 = vmatprep.subr.bf16.mxu1 %v4011_v5 }
 0x533   : > { %3639 = vmatpush3.bf16.msra.mxu0 %v4011_v5  ;;  %3708 = vmatpush3.bf16.msra.mxu1 %v4011_v5 }
 0x534   : > { %3640 = vmatprep.subr.bf16.mxu0 %v4012_v45  ;;  %3701 = vmatprep.subr.bf16.mxu1 %v4012_v45 }
 0x537   : > { %3641 = vmatpush3.bf16.msra.mxu0 %v4012_v45  ;;  %3709 = vmatpush3.bf16.msra.mxu1 %v4012_v45 }
 0x538   : > { %3642 = vmatprep.subr.bf16.mxu0 %v4013_v28  ;;  %3702 = vmatprep.subr.bf16.mxu1 %v4013_v28 }
 0x53b   : > { %3643 = vmatpush3.bf16.msra.mxu0 %v4013_v28  ;;  %3710 = vmatpush3.bf16.msra.mxu1 %v4013_v28 }
 0x53c   : > { %3644 = vmatprep.subr.bf16.mxu0 %v4014_v19  ;;  %3703 = vmatprep.subr.bf16.mxu1 %v4014_v19 }
 0x53f   : > { %3645 = vmatpush3.bf16.msra.mxu0 %v4014_v19  ;;  %3711 = vmatpush3.bf16.msra.mxu1 %v4014_v19 }
 0x540   : > { %3646 = vmatprep.subr.bf16.mxu0 %v4015_v31  ;;  %3704 = vmatprep.subr.bf16.mxu1 %v4015_v31 }
 0x543   : > { %3647 = vmatpush3.bf16.msra.mxu0 %v4015_v31  ;;  %3712 = vmatpush3.bf16.msra.mxu1 %v4015_v31 }
 0x544   : > { %3648 = vmatprep.subr.bf16.mxu0 %v4016_v42  ;;  %3705 = vmatprep.subr.bf16.mxu1 %v4016_v42 }
 0x547   : > { %3649 = vmatpush3.bf16.msra.mxu0 %v4016_v42  ;;  %3713 = vmatpush3.bf16.msra.mxu1 %v4016_v42 }
 0x54a   : > { %3651 = vmatmul.mubr.bf16.vlgmr.msra.gmra.mxu0 %v2750_v25  ;;  %3659 = vmatmul.mubr.bf16.vlgmr.msra.gmra.mxu1 %v2754_v17 }
 0x54b   : > { %3654 = vmatprep.mubr.bf16.mxu0 %v2751_v2  ;;  %3662 = vmatprep.mubr.bf16.mxu1 %v2755_v3 }
 0x552   : > { %3655 = vmatmul.mubr.bf16.gmra.mxu0 %v2752_v7  ;;  %3663 = vmatmul.mubr.bf16.gmra.mxu1 %v2756_v34 }
 0x60a   : > { %v3652_v16 = vpop.f32.mrf.mxu0  ;;  %v3660_v51 = vpop.f32.mrf.mxu1 }
 0x60b   : > { %v2871_v53 = vadd.f32 %v3652_v16, %v3212_v32  ;;  %v2903_v60 = vadd.f32 %v3660_v51, %v3212_v32 }
 0x60c   : > { %v2862_v30 = vpop.f32.mrf.mxu0  ;;  %v2894_v47 = vpop.f32.mrf.mxu1 }
 0x60d   : > { %2927 = vst [vmem:[%s4942_s14 + $0x10] sm:$0xff] %v2871_v53  ;;  %2935 = vst [vmem:[%s4942_s14 + $0x50] sm:$0xff] %v2903_v60  ;;  %v2863_v33 = vadd.f32 %v3212_v32, %v2862_v30  ;;  %v2895_v48 = vadd.f32 %v3212_v32, %v2894_v47 }
 0x60e   : > { %v3653_v50 = vpop.f32.mrf.mxu0  ;;  %v3661_v21 = vpop.f32.mrf.mxu1 }
 0x60f   : > { %2925 = vst [vmem:[%s4942_s14] sm:$0xff] %v2863_v33  ;;  %2933 = vst [vmem:[%s4942_s14 + $0x40] sm:$0xff] %v2895_v48  ;;  %v2874_v40 = vadd.f32 %v3653_v50, %v3212_v32  ;;  %v2906_v1 = vadd.f32 %v3661_v21, %v3212_v32 }
 0x610   : > { %v2865_v8 = vpop.f32.mrf.mxu0  ;;  %v2897_v54 = vpop.f32.mrf.mxu1 }
 0x611   : > { %2928 = vst [vmem:[%s4942_s14 + $0x18] sm:$0xff] %v2874_v40  ;;  %2936 = vst [vmem:[%s4942_s14 + $0x58] sm:$0xff] %v2906_v1  ;;  %v2866_v41 = vadd.f32 %v3212_v32, %v2865_v8  ;;  %v2898_v18 = vadd.f32 %v3212_v32, %v2897_v54 }
 0x612   : > { %v3656_v36 = vpop.f32.mrf.mxu0  ;;  %v3664_v56 = vpop.f32.mrf.mxu1 }
 0x613   : > { %2926 = vst [vmem:[%s4942_s14 + $0x8] sm:$0xff] %v2866_v41  ;;  %2934 = vst [vmem:[%s4942_s14 + $0x48] sm:$0xff] %v2898_v18  ;;  %v2887_v61 = vadd.f32 %v3656_v36, %v3212_v32  ;;  %v2919_v58 = vadd.f32 %v3664_v56, %v3212_v32 }
 0x614   : > { %v2878_v26 = vpop.f32.mrf.mxu0  ;;  %v2910_v12 = vpop.f32.mrf.mxu1 }
 0x615   : > { %2931 = vst [vmem:[%s4942_s14 + $0x30] sm:$0xff] %v2887_v61  ;;  %2939 = vst [vmem:[%s4942_s14 + $0x70] sm:$0xff] %v2919_v58  ;;  %v2879_v20 = vadd.f32 %v3212_v32, %v2878_v26  ;;  %v2911_v55 = vadd.f32 %v3212_v32, %v2910_v12 }
 0x616   : > { %v3657_v43 = vpop.f32.mrf.mxu0  ;;  %v3665_v62 = vpop.f32.mrf.mxu1 }
 0x617   : > { %2929 = vst [vmem:[%s4942_s14 + $0x20] sm:$0xff] %v2879_v20  ;;  %2937 = vst [vmem:[%s4942_s14 + $0x60] sm:$0xff] %v2911_v55  ;;  %v2890_v57 = vadd.f32 %v3657_v43, %v3212_v32  ;;  %v2922_v59 = vadd.f32 %v3665_v62, %v3212_v32 }
 0x618   : > { %v2881_v9 = vpop.f32.mrf.mxu0  ;;  %v2913_v23 = vpop.f32.mrf.mxu1 }
 0x619   : > { %2932 = vst [vmem:[%s4942_s14 + $0x38] sm:$0xff] %v2890_v57  ;;  %2940 = vst [vmem:[%s4942_s14 + $0x78] sm:$0xff] %v2922_v59  ;;  %v2882_v63 = vadd.f32 %v3212_v32, %v2881_v9  ;;  %v2914_v29 = vadd.f32 %v3212_v32, %v2913_v23 }
 0x61b   : > { %2930 = vst [vmem:[%s4942_s14 + $0x28] sm:$0xff] %v2882_v63  ;;  %2938 = vst [vmem:[%s4942_s14 + $0x68] sm:$0xff] %v2914_v29 }
 0x61c PF: > { %s24_s15 = sadd.s32 1, %s4039_s15   ;;  %s4959_s29 = smov %s4035_s30 }
 0x61d   : > { %p21_p12 = scmp.ge.s32.totalorder %s24_s15, 6   ;;  %s4960_s30 = smov %s4962_s16 }
 0x61f   :  { %23 = sbr.rel (!%p21_p12) target bundleno = 3 (0x3), region = 128 }

</bundles_post_ra>
